<compile_context>
chip_gen: v7x
topology: tpu7x:2x2x1
jax: 0.10.0
libtpu: 0.0.40
codegen_flags: <defaults>
</compile_context>

<pallas_src>
import functools

import jax
import jax.numpy as jnp
from jax.experimental import pallas as pl
from jax.experimental.pallas import tpu as pltpu

LN_EPS = 1e-5
LANE = 128
SUBLANE = 8


def _rup(n, m):
    return (n + m - 1) // m * m


# --------------------------------------------------------------------------
# Parameter packing: all params -> 2 (8,128)-aligned resident VMEM slabs.
# --------------------------------------------------------------------------
def pack_params(params, in_features, latent_size, param_dtype=jnp.float32):
    F, L = in_features, latent_size

    # ---- fused z-branch (decoder | predictor): 8 -> 6 MXU matmuls ----
    zcat_w = jnp.concatenate([params["dec1_w"], params["pred1_w"]], axis=1)   # (L,108)
    zcat_b = jnp.concatenate([params["dec1_b"], params["pred1_b"]], axis=1)
    zcat_g = jnp.concatenate([params["dec1_g"], params["pred1_g"]], axis=1)
    zcat_bt = jnp.concatenate([params["dec1_bt"], params["pred1_bt"]], axis=1)

    hcat_w = jnp.zeros((108, 120), jnp.float32)                               # block-diag
    hcat_w = hcat_w.at[0:48, 0:90].set(params["dec2_w"].astype(jnp.float32))
    hcat_w = hcat_w.at[48:108, 90:120].set(params["pred2_w"].astype(jnp.float32))
    hcat_b = jnp.concatenate([params["dec2_b"], params["pred2_b"]], axis=1)
    hcat_g = jnp.concatenate([params["dec2_g"], params["pred2_g"]], axis=1)
    hcat_bt = jnp.concatenate([params["dec2_bt"], params["pred2_bt"]], axis=1)

    # out layer reads the fused 120-wide activation (predictor cols hit 0 rows)
    out_w = jnp.zeros((120, F), jnp.float32).at[0:90, :].set(
        params["out_w"].astype(jnp.float32))
    # 30->1 predictor head as one 120-wide VPU row (decoder cols are zero)
    pred_row = jnp.zeros((1, 120), jnp.float32).at[:, 90:120].set(
        params["pred_out_w"].astype(jnp.float32).T)

    w_list = [("enc1", params["enc1_w"]), ("enc2", params["enc2_w"]),
              ("latent", params["latent_w"]), ("zcat", zcat_w),
              ("hcat", hcat_w), ("out", out_w)]
    v_list = [("enc1_b", params["enc1_b"]), ("enc1_g", params["enc1_g"]),
              ("enc1_bt", params["enc1_bt"]),
              ("enc2_b", params["enc2_b"]), ("enc2_g", params["enc2_g"]),
              ("enc2_bt", params["enc2_bt"]),
              ("latent_b", params["latent_b"]),
              ("zcat_b", zcat_b), ("zcat_g", zcat_g), ("zcat_bt", zcat_bt),
              ("hcat_b", hcat_b), ("hcat_g", hcat_g), ("hcat_bt", hcat_bt),
              ("out_b", params["out_b"]),
              ("pred_row", pred_row), ("pred_out_b", params["pred_out_b"])]

    padw = _rup(max(max(w.shape[1] for _, w in w_list),
                    max(v.shape[1] for _, v in v_list)), LANE)

    # Weight slab: each (fin, fout) block padded to (rup(fin,8), padw), stacked.
    w_blocks, w_off, row = [], {}, 0
    for name, w in w_list:
        fin, fout = w.shape
        rows = _rup(fin, SUBLANE)
        blk = jnp.zeros((rows, padw), param_dtype).at[:fin, :fout].set(
            w.astype(param_dtype))
        w_blocks.append(blk)
        w_off[name] = row
        row += rows
    w_slab = jnp.concatenate(w_blocks, axis=0)

    # Vector slab: one row per bias / LN gain / LN shift / pred-head row.
    v_rows, v_off = [], {}
    for i, (k, v) in enumerate(v_list):
        v_off[k] = i
        v_rows.append(jnp.zeros((1, padw), param_dtype).at[:, : v.shape[1]].set(
            v.astype(param_dtype)))
    n = len(v_rows)
    pad_rows = _rup(n, SUBLANE) - n
    if pad_rows:
        v_rows.append(jnp.zeros((pad_rows, padw), param_dtype))
    v_slab = jnp.concatenate(v_rows, axis=0)

    return w_slab, v_slab, w_off, v_off


# --------------------------------------------------------------------------
# Kernel: one batch tile per grid step; parameter slabs are resident.
# --------------------------------------------------------------------------
def _wae_kernel(x_ref, w_ref, v_ref, xr_ref, z_ref, pro_ref, *,
                in_features, latent_size, w_off, v_off):
    F, L = in_features, latent_size
    f32 = jnp.float32
    x = x_ref[...].astype(f32)

    def linear(h, name, fin, fout):
        w = w_ref[w_off[name]:w_off[name] + fin, 0:fout]
        b = v_ref[v_off[name + "_b"]:v_off[name + "_b"] + 1, 0:fout]
        prec = (jax.lax.Precision.HIGHEST if w.dtype == jnp.float32
                else jax.lax.Precision.DEFAULT)
        return (jnp.dot(h.astype(w.dtype), w,
                        preferred_element_type=f32, precision=prec)
                + b.astype(f32))

    def ln_relu(h, name):
        n = h.shape[-1]
        g = v_ref[v_off[name + "_g"]:v_off[name + "_g"] + 1, 0:n].astype(f32)
        bt = v_ref[v_off[name + "_bt"]:v_off[name + "_bt"] + 1, 0:n].astype(f32)
        mean = jnp.mean(h, axis=-1, keepdims=True)
        c = h - mean
        var = jnp.mean(c * c, axis=-1, keepdims=True)
        return jnp.maximum(c * jax.lax.rsqrt(var + LN_EPS) * g + bt, 0.0)

    def seg_ln_relu(h, name, na, nb):
        # LayerNorm applied independently to cols [0,na) and [na,na+nb) of the
        # fused (decoder | predictor) activation, using masked reductions
        # (VPU + XLU only; no lane-offset slices or concatenates).
        n = na + nb
        col = jax.lax.broadcasted_iota(jnp.int32, (1, n), 1)
        ma = (col < na).astype(f32)
        mb = 1.0 - ma
        sa = jnp.sum(h * ma, axis=-1, keepdims=True)
        sb = jnp.sum(h * mb, axis=-1, keepdims=True)
        mean = ma * (sa * (1.0 / na)) + mb * (sb * (1.0 / nb))
        c = h - mean
        c2 = c * c
        va = jnp.sum(c2 * ma, axis=-1, keepdims=True) * (1.0 / na)
        vb = jnp.sum(c2 * mb, axis=-1, keepdims=True) * (1.0 / nb)
        inv = (ma * jax.lax.rsqrt(va + LN_EPS)
               + mb * jax.lax.rsqrt(vb + LN_EPS))
        g = v_ref[v_off[name + "_g"]:v_off[name + "_g"] + 1, 0:n].astype(f32)
        bt = v_ref[v_off[name + "_bt"]:v_off[name + "_bt"] + 1, 0:n].astype(f32)
        return jnp.maximum(c * inv * g + bt, 0.0)

    # ---- encoder ----
    h = ln_relu(linear(x, "enc1", F, 90), "enc1")
    h = ln_relu(linear(h, "enc2", 90, 48), "enc2")
    z = linear(h, "latent", 48, L)
    z_ref[...] = z.astype(z_ref.dtype)

    # ---- fused decoder/predictor trunk (two matmuls instead of four) ----
    zc = seg_ln_relu(linear(z, "zcat", L, 108), "zcat", 48, 60)      # [dec1|pred1]
    hc = seg_ln_relu(linear(zc, "hcat", 108, 120), "hcat", 90, 30)   # [dec2|pred2]

    # ---- decoder head: softmax over the feature axis (dim=1), exact division ----
    logits = linear(hc, "out", 120, F)
    m = jnp.max(logits, axis=-1, keepdims=True)
    e = jnp.exp(logits - m)
    xr_ref[...] = (e / jnp.sum(e, axis=-1, keepdims=True)).astype(xr_ref.dtype)

    # ---- predictor head: 30->1 on the VPU (broadcast-mul + lane reduce) ----
    pw = v_ref[v_off["pred_row"]:v_off["pred_row"] + 1, 0:120].astype(f32)
    pb = v_ref[v_off["pred_out_b"]:v_off["pred_out_b"] + 1, 0:1].astype(f32)
    pro_ref[...] = (jnp.sum(hc * pw, axis=-1, keepdims=True) + pb).astype(pro_ref.dtype)


# --------------------------------------------------------------------------
# Wrapper
# --------------------------------------------------------------------------
def wae_forward(x, params, *, param_dtype=jnp.float32, tb_max=2048,
                min_grid_steps=2):
    batch, F = x.shape
    L = params["latent_w"].shape[1]

    w_slab, v_slab, w_off, v_off = pack_params(params, F, L, param_dtype)

    # Batch tiling: big tiles (up to tb_max) to amortize the ~0.35us/step
    # overhead; at least `min_grid_steps` steps when the batch allows so v7x
    # can shard the "parallel" grid axis across its 2 TensorCores.  x is only
    # padded by <8 rows when batch % 8 != 0; ragged tails use the cdiv grid.
    batch_p = _rup(batch, SUBLANE)
    tb = min(tb_max, batch_p)
    if min_grid_steps > 1 and batch_p >= min_grid_steps * SUBLANE:
        tb = min(tb, _rup(pl.cdiv(batch_p, min_grid_steps), SUBLANE))
    tb = max(tb, SUBLANE)
    grid = (pl.cdiv(batch_p, tb),)
    x_p = x if batch_p == batch else jnp.pad(x, ((0, batch_p - batch), (0, 0)))

    kernel = functools.partial(
        _wae_kernel, in_features=F, latent_size=L, w_off=w_off, v_off=v_off)

    flops_row = 2 * (F * 90 + 90 * 48 + 48 * L + L * 108 + 108 * 120
                     + 120 * F + 120)
    bytes_accessed = (x_p.size * x_p.dtype.itemsize
                      + batch_p * (F + L + 1) * 4
                      + w_slab.size * w_slab.dtype.itemsize
                      + v_slab.size * v_slab.dtype.itemsize)

    xr, z, pro = pl.pallas_call(
        kernel,
        out_shape=(jax.ShapeDtypeStruct((batch_p, F), jnp.float32),
                   jax.ShapeDtypeStruct((batch_p, L), jnp.float32),
                   jax.ShapeDtypeStruct((batch_p, 1), jnp.float32)),
        grid=grid,
        in_specs=[
            pl.BlockSpec((tb, F), lambda i: (i, 0)),         # x: tiled over batch
            pl.BlockSpec(w_slab.shape, lambda i: (0, 0)),    # weight slab: resident
            pl.BlockSpec(v_slab.shape, lambda i: (0, 0)),    # vector slab: resident
        ],
        out_specs=(pl.BlockSpec((tb, F), lambda i: (i, 0)),  # natural-width outputs
                   pl.BlockSpec((tb, L), lambda i: (i, 0)),
                   pl.BlockSpec((tb, 1), lambda i: (i, 0))),
        compiler_params=pltpu.CompilerParams(
            dimension_semantics=("parallel",)),
        cost_estimate=pl.CostEstimate(
            flops=int(batch_p * flops_row),
            transcendentals=int(batch_p * (F + 6)),
            bytes_accessed=int(bytes_accessed)),
    )(x_p, w_slab, v_slab)

    if batch_p != batch:
        xr, z, pro = xr[:batch], z[:batch], pro[:batch]
    return xr, z, pro


# --------------------------------------------------------------------------
# Synthetic params + pure-JAX reference
# --------------------------------------------------------------------------
def init_wae_params(key, in_features, latent_size, dtype=jnp.float32):
    dims = {
        "enc1": (in_features, 90, True),
        "enc2": (90, 48, True),
        "latent": (48, latent_size, False),
        "dec1": (latent_size, 48, True),
        "dec2": (48, 90, True),
        "out": (90, in_features, False),
        "pred1": (latent_size, 60, True),
        "pred2": (60, 30, True),
        "pred_out": (30, 1, False),
    }
    params = {}
    for name, (fin, fout, has_ln) in dims.items():
        key, kw, kb, kg, kbt = jax.random.split(key, 5)
        scale = 1.0 / jnp.sqrt(jnp.asarray(fin, dtype))
        params[name + "_w"] = jax.random.normal(kw, (fin, fout), dtype) * scale
        params[name + "_b"] = jax.random.normal(kb, (1, fout), dtype) * 0.01
        if has_ln:
            params[name + "_g"] = 1.0 + 0.05 * jax.random.normal(kg, (1, fout), dtype)
            params[name + "_bt"] = 0.05 * jax.random.normal(kbt, (1, fout), dtype)
    return params


def wae_forward_ref(x, params):
    hp = jax.lax.Precision.HIGHEST   # match the kernel's full-f32 matmuls

    def lin(h, name):
        return jnp.dot(h, params[name + "_w"], precision=hp) + params[name + "_b"]

    def ln_relu(h, name):
        mean = jnp.mean(h, axis=-1, keepdims=True)
        var = jnp.mean((h - mean) ** 2, axis=-1, keepdims=True)
        h = (h - mean) / jnp.sqrt(var + LN_EPS)
        h = h * params[name + "_g"] + params[name + "_bt"]
        return jnp.maximum(h, 0.0)

    h = ln_relu(lin(x, "enc1"), "enc1")
    h = ln_relu(lin(h, "enc2"), "enc2")
    z = lin(h, "latent")

    d = ln_relu(lin(z, "dec1"), "dec1")
    d = ln_relu(lin(d, "dec2"), "dec2")
    x_reconst = jax.nn.softmax(lin(d, "out"), axis=1)

    p = ln_relu(lin(z, "pred1"), "pred1")
    p = ln_relu(lin(p, "pred2"), "pred2")
    pro_out = lin(p, "pred_out")
    return x_reconst, z, pro_out


if __name__ == "__main__":
    in_features = 16
    latent_size = 8
    batch = 8

    key = jax.random.PRNGKey(0)
    key_x, key_p = jax.random.split(key)
    x = jax.random.normal(key_x, (batch, in_features), jnp.float32)
    params = init_wae_params(key_p, in_features, latent_size)

    xr_ref, z_ref, pro_ref = wae_forward_ref(x, params)

    # Default f32 path: must match the reference closely (exact softmax
    # division + HIGHEST-precision matmuls on both sides).
    x_reconst, z, pro_out = jax.block_until_ready(wae_forward(x, params))
    assert x_reconst.shape == (batch, in_features)
    assert z.shape == (batch, latent_size)
    assert pro_out.shape == (batch, 1)
    assert jnp.allclose(x_reconst, xr_ref, atol=1e-4, rtol=1e-4)
    assert jnp.allclose(z, z_ref, atol=1e-4, rtol=1e-4)
    assert jnp.allclose(pro_out, pro_ref, atol=1e-4, rtol=1e-4)

    # bf16-operand path (v6e/v7x MXU-rate mode): sanity-check it runs and
    # stays finite; bf16 weights only warrant a loose numerical check.
    xr16, z16, pro16 = jax.block_until_ready(
        wae_forward(x, params, param_dtype=jnp.bfloat16))
    assert bool(jnp.all(jnp.isfinite(xr16)))
    assert bool(jnp.all(jnp.isfinite(z16)))
    assert bool(jnp.all(jnp.isfinite(pro16)))
    assert jnp.allclose(xr16, xr_ref, atol=0.1)

    print("KERNEL_OK")
</pallas_src>

<mosaic_0001>
module attributes {stable_mosaic.version = 11 : i64} {
  func.func @_wae_kernel(%arg0: i32, %arg1: memref<8x16xf32, #tpu.memory_space<vmem>>, %arg2: memref<400x128xf32, #tpu.memory_space<vmem>>, %arg3: memref<16x128xf32, #tpu.memory_space<vmem>>, %arg4: memref<8x16xf32, #tpu.memory_space<vmem>>, %arg5: memref<8x8xf32, #tpu.memory_space<vmem>>, %arg6: memref<8x1xf32, #tpu.memory_space<vmem>>) attributes {dimension_semantics = [#tpu.dimension_semantics<parallel>], iteration_bounds = array<i64: 1>, scalar_prefetch = 0 : i64, scratch_operands = 0 : i64, tpu.core_type = #tpu.core_type<tc>, window_params = [{transform_indices = @transform_0, window_bounds = array<i64: 8, 16>}, {pipeline_mode = #tpu.pipeline_mode<synchronous>, transform_indices = @transform_1, window_bounds = array<i64: 400, 128>}, {pipeline_mode = #tpu.pipeline_mode<synchronous>, transform_indices = @transform_2, window_bounds = array<i64: 16, 128>}, {transform_indices = @transform_3, window_bounds = array<i64: 8, 16>}, {transform_indices = @transform_4, window_bounds = array<i64: 8, 8>}, {transform_indices = @transform_5, window_bounds = array<i64: 8, 1>}]} {
    %c0 = arith.constant 0 : index
    %c0_0 = arith.constant 0 : index
    %0 = vector.load %arg1[%c0, %c0_0] : memref<8x16xf32, #tpu.memory_space<vmem>>, vector<8x16xf32>
    %c0_1 = arith.constant 0 : index
    %c0_2 = arith.constant 0 : index
    %1 = vector.load %arg2[%c0_1, %c0_2] : memref<400x128xf32, #tpu.memory_space<vmem>>, vector<16x90xf32>
    %c0_3 = arith.constant 0 : index
    %c0_4 = arith.constant 0 : index
    %2 = vector.load %arg3[%c0_3, %c0_4] : memref<16x128xf32, #tpu.memory_space<vmem>>, vector<1x90xf32>
    %cst = arith.constant dense<0.000000e+00> : vector<8x90xf32>
    %3 = tpu.matmul %0, %1, %cst {dimension_numbers = #tpu.dot_dimension_numbers<[1], [0], [0], [1], [0, 0, 1, 1], [], []>, precision = #tpu.contract_precision<fp32>} : vector<8x16xf32>, vector<16x90xf32>, vector<8x90xf32> -> vector<8x90xf32>
    %4 = vector.broadcast %2 : vector<1x90xf32> to vector<8x90xf32>
    %5 = arith.addf %3, %4 : vector<8x90xf32>
    %c1 = arith.constant 1 : index
    %c0_5 = arith.constant 0 : index
    %6 = vector.load %arg3[%c1, %c0_5] : memref<16x128xf32, #tpu.memory_space<vmem>>, vector<1x90xf32>
    %c2 = arith.constant 2 : index
    %c0_6 = arith.constant 0 : index
    %7 = vector.load %arg3[%c2, %c0_6] : memref<16x128xf32, #tpu.memory_space<vmem>>, vector<1x90xf32>
    %cst_7 = arith.constant dense<0.000000e+00> : vector<8xf32>
    %8 = vector.multi_reduction <add>, %5, %cst_7 [1] : vector<8x90xf32> to vector<8xf32>
    %9 = vector.shape_cast %8 : vector<8xf32> to vector<8x1xf32>
    %cst_8 = arith.constant 9.000000e+01 : f32
    %10 = vector.broadcast %cst_8 : f32 to vector<8x1xf32>
    %11 = arith.divf %9, %10 : vector<8x1xf32>
    %12 = vector.broadcast %11 : vector<8x1xf32> to vector<8x90xf32>
    %13 = arith.subf %5, %12 : vector<8x90xf32>
    %14 = arith.mulf %13, %13 : vector<8x90xf32>
    %cst_9 = arith.constant dense<0.000000e+00> : vector<8xf32>
    %15 = vector.multi_reduction <add>, %14, %cst_9 [1] : vector<8x90xf32> to vector<8xf32>
    %16 = vector.shape_cast %15 : vector<8xf32> to vector<8x1xf32>
    %cst_10 = arith.constant 9.000000e+01 : f32
    %17 = vector.broadcast %cst_10 : f32 to vector<8x1xf32>
    %18 = arith.divf %16, %17 : vector<8x1xf32>
    %cst_11 = arith.constant 9.99999974E-6 : f32
    %19 = vector.broadcast %cst_11 : f32 to vector<8x1xf32>
    %20 = arith.addf %18, %19 : vector<8x1xf32>
    %21 = math.rsqrt %20 : vector<8x1xf32>
    %22 = vector.broadcast %21 : vector<8x1xf32> to vector<8x90xf32>
    %23 = arith.mulf %13, %22 : vector<8x90xf32>
    %24 = vector.broadcast %6 : vector<1x90xf32> to vector<8x90xf32>
    %25 = arith.mulf %23, %24 : vector<8x90xf32>
    %26 = vector.broadcast %7 : vector<1x90xf32> to vector<8x90xf32>
    %27 = arith.addf %25, %26 : vector<8x90xf32>
    %cst_12 = arith.constant 0.000000e+00 : f32
    %28 = vector.broadcast %cst_12 : f32 to vector<8x90xf32>
    %29 = arith.maximumf %27, %28 : vector<8x90xf32>
    %c16 = arith.constant 16 : index
    %c0_13 = arith.constant 0 : index
    %30 = vector.load %arg2[%c16, %c0_13] : memref<400x128xf32, #tpu.memory_space<vmem>>, vector<90x48xf32>
    %c3 = arith.constant 3 : index
    %c0_14 = arith.constant 0 : index
    %31 = vector.load %arg3[%c3, %c0_14] : memref<16x128xf32, #tpu.memory_space<vmem>>, vector<1x48xf32>
    %cst_15 = arith.constant dense<0.000000e+00> : vector<8x48xf32>
    %32 = tpu.matmul %29, %30, %cst_15 {dimension_numbers = #tpu.dot_dimension_numbers<[1], [0], [0], [1], [0, 0, 1, 1], [], []>, precision = #tpu.contract_precision<fp32>} : vector<8x90xf32>, vector<90x48xf32>, vector<8x48xf32> -> vector<8x48xf32>
    %33 = vector.broadcast %31 : vector<1x48xf32> to vector<8x48xf32>
    %34 = arith.addf %32, %33 : vector<8x48xf32>
    %c4 = arith.constant 4 : index
    %c0_16 = arith.constant 0 : index
    %35 = vector.load %arg3[%c4, %c0_16] : memref<16x128xf32, #tpu.memory_space<vmem>>, vector<1x48xf32>
    %c5 = arith.constant 5 : index
    %c0_17 = arith.constant 0 : index
    %36 = vector.load %arg3[%c5, %c0_17] : memref<16x128xf32, #tpu.memory_space<vmem>>, vector<1x48xf32>
    %cst_18 = arith.constant dense<0.000000e+00> : vector<8xf32>
    %37 = vector.multi_reduction <add>, %34, %cst_18 [1] : vector<8x48xf32> to vector<8xf32>
    %38 = vector.shape_cast %37 : vector<8xf32> to vector<8x1xf32>
    %cst_19 = arith.constant 4.800000e+01 : f32
    %39 = vector.broadcast %cst_19 : f32 to vector<8x1xf32>
    %40 = arith.divf %38, %39 : vector<8x1xf32>
    %41 = vector.broadcast %40 : vector<8x1xf32> to vector<8x48xf32>
    %42 = arith.subf %34, %41 : vector<8x48xf32>
    %43 = arith.mulf %42, %42 : vector<8x48xf32>
    %cst_20 = arith.constant dense<0.000000e+00> : vector<8xf32>
    %44 = vector.multi_reduction <add>, %43, %cst_20 [1] : vector<8x48xf32> to vector<8xf32>
    %45 = vector.shape_cast %44 : vector<8xf32> to vector<8x1xf32>
    %cst_21 = arith.constant 4.800000e+01 : f32
    %46 = vector.broadcast %cst_21 : f32 to vector<8x1xf32>
    %47 = arith.divf %45, %46 : vector<8x1xf32>
    %cst_22 = arith.constant 9.99999974E-6 : f32
    %48 = vector.broadcast %cst_22 : f32 to vector<8x1xf32>
    %49 = arith.addf %47, %48 : vector<8x1xf32>
    %50 = math.rsqrt %49 : vector<8x1xf32>
    %51 = vector.broadcast %50 : vector<8x1xf32> to vector<8x48xf32>
    %52 = arith.mulf %42, %51 : vector<8x48xf32>
    %53 = vector.broadcast %35 : vector<1x48xf32> to vector<8x48xf32>
    %54 = arith.mulf %52, %53 : vector<8x48xf32>
    %55 = vector.broadcast %36 : vector<1x48xf32> to vector<8x48xf32>
    %56 = arith.addf %54, %55 : vector<8x48xf32>
    %cst_23 = arith.constant 0.000000e+00 : f32
    %57 = vector.broadcast %cst_23 : f32 to vector<8x48xf32>
    %58 = arith.maximumf %56, %57 : vector<8x48xf32>
    %c112 = arith.constant 112 : index
    %c0_24 = arith.constant 0 : index
    %59 = vector.load %arg2[%c112, %c0_24] : memref<400x128xf32, #tpu.memory_space<vmem>>, vector<48x8xf32>
    %c6 = arith.constant 6 : index
    %c0_25 = arith.constant 0 : index
    %60 = vector.load %arg3[%c6, %c0_25] : memref<16x128xf32, #tpu.memory_space<vmem>>, vector<1x8xf32>
    %cst_26 = arith.constant dense<0.000000e+00> : vector<8x8xf32>
    %61 = tpu.matmul %58, %59, %cst_26 {dimension_numbers = #tpu.dot_dimension_numbers<[1], [0], [0], [1], [0, 0, 1, 1], [], []>, precision = #tpu.contract_precision<fp32>} : vector<8x48xf32>, vector<48x8xf32>, vector<8x8xf32> -> vector<8x8xf32>
    %62 = vector.broadcast %60 : vector<1x8xf32> to vector<8x8xf32>
    %63 = arith.addf %61, %62 : vector<8x8xf32>
    %c0_27 = arith.constant 0 : index
    %c0_28 = arith.constant 0 : index
    %64 = vector.load %arg5[%c0_27, %c0_28] : memref<8x8xf32, #tpu.memory_space<vmem>>, vector<8x8xf32>
    tpu.vector_store %arg5[%c0_27, %c0_28], %63 {strides = array<i32>} : memref<8x8xf32, #tpu.memory_space<vmem>>, vector<8x8xf32>,
    %c160 = arith.constant 160 : index
    %c0_29 = arith.constant 0 : index
    %65 = vector.load %arg2[%c160, %c0_29] : memref<400x128xf32, #tpu.memory_space<vmem>>, vector<8x108xf32>
    %c7 = arith.constant 7 : index
    %c0_30 = arith.constant 0 : index
    %66 = vector.load %arg3[%c7, %c0_30] : memref<16x128xf32, #tpu.memory_space<vmem>>, vector<1x108xf32>
    %cst_31 = arith.constant dense<0.000000e+00> : vector<8x108xf32>
    %67 = tpu.matmul %63, %65, %cst_31 {dimension_numbers = #tpu.dot_dimension_numbers<[1], [0], [0], [1], [0, 0, 1, 1], [], []>, precision = #tpu.contract_precision<fp32>} : vector<8x8xf32>, vector<8x108xf32>, vector<8x108xf32> -> vector<8x108xf32>
    %68 = vector.broadcast %66 : vector<1x108xf32> to vector<8x108xf32>
    %69 = arith.addf %67, %68 : vector<8x108xf32>
    %70 = tpu.iota {dimensions = array<i32: 1>} : vector<1x108xi32>
    %c48_i32 = arith.constant 48 : i32
    %71 = vector.broadcast %c48_i32 : i32 to vector<1x108xi32>
    %72 = arith.cmpi slt, %70, %71 : vector<1x108xi32>
    %73 = arith.extui %72 : vector<1x108xi1> to vector<1x108xi32>
    %74 = arith.sitofp %73 : vector<1x108xi32> to vector<1x108xf32>
    %cst_32 = arith.constant 1.000000e+00 : f32
    %75 = vector.broadcast %cst_32 : f32 to vector<1x108xf32>
    %76 = arith.subf %75, %74 : vector<1x108xf32>
    %77 = vector.broadcast %74 : vector<1x108xf32> to vector<8x108xf32>
    %78 = arith.mulf %69, %77 : vector<8x108xf32>
    %cst_33 = arith.constant dense<0.000000e+00> : vector<8xf32>
    %79 = vector.multi_reduction <add>, %78, %cst_33 [1] : vector<8x108xf32> to vector<8xf32>
    %80 = vector.shape_cast %79 : vector<8xf32> to vector<8x1xf32>
    %81 = vector.broadcast %76 : vector<1x108xf32> to vector<8x108xf32>
    %82 = arith.mulf %69, %81 : vector<8x108xf32>
    %cst_34 = arith.constant dense<0.000000e+00> : vector<8xf32>
    %83 = vector.multi_reduction <add>, %82, %cst_34 [1] : vector<8x108xf32> to vector<8xf32>
    %84 = vector.shape_cast %83 : vector<8xf32> to vector<8x1xf32>
    %cst_35 = arith.constant 0.020833334 : f32
    %85 = vector.broadcast %cst_35 : f32 to vector<8x1xf32>
    %86 = arith.mulf %80, %85 : vector<8x1xf32>
    %87 = vector.broadcast %74 : vector<1x108xf32> to vector<8x108xf32>
    %88 = vector.broadcast %86 : vector<8x1xf32> to vector<8x108xf32>
    %89 = arith.mulf %87, %88 : vector<8x108xf32>
    %cst_36 = arith.constant 0.0166666675 : f32
    %90 = vector.broadcast %cst_36 : f32 to vector<8x1xf32>
    %91 = arith.mulf %84, %90 : vector<8x1xf32>
    %92 = vector.broadcast %76 : vector<1x108xf32> to vector<8x108xf32>
    %93 = vector.broadcast %91 : vector<8x1xf32> to vector<8x108xf32>
    %94 = arith.mulf %92, %93 : vector<8x108xf32>
    %95 = arith.addf %89, %94 : vector<8x108xf32>
    %96 = arith.subf %69, %95 : vector<8x108xf32>
    %97 = arith.mulf %96, %96 : vector<8x108xf32>
    %98 = vector.broadcast %74 : vector<1x108xf32> to vector<8x108xf32>
    %99 = arith.mulf %97, %98 : vector<8x108xf32>
    %cst_37 = arith.constant dense<0.000000e+00> : vector<8xf32>
    %100 = vector.multi_reduction <add>, %99, %cst_37 [1] : vector<8x108xf32> to vector<8xf32>
    %101 = vector.shape_cast %100 : vector<8xf32> to vector<8x1xf32>
    %cst_38 = arith.constant 0.020833334 : f32
    %102 = vector.broadcast %cst_38 : f32 to vector<8x1xf32>
    %103 = arith.mulf %101, %102 : vector<8x1xf32>
    %104 = vector.broadcast %76 : vector<1x108xf32> to vector<8x108xf32>
    %105 = arith.mulf %97, %104 : vector<8x108xf32>
    %cst_39 = arith.constant dense<0.000000e+00> : vector<8xf32>
    %106 = vector.multi_reduction <add>, %105, %cst_39 [1] : vector<8x108xf32> to vector<8xf32>
    %107 = vector.shape_cast %106 : vector<8xf32> to vector<8x1xf32>
    %cst_40 = arith.constant 0.0166666675 : f32
    %108 = vector.broadcast %cst_40 : f32 to vector<8x1xf32>
    %109 = arith.mulf %107, %108 : vector<8x1xf32>
    %cst_41 = arith.constant 9.99999974E-6 : f32
    %110 = vector.broadcast %cst_41 : f32 to vector<8x1xf32>
    %111 = arith.addf %103, %110 : vector<8x1xf32>
    %112 = math.rsqrt %111 : vector<8x1xf32>
    %113 = vector.broadcast %74 : vector<1x108xf32> to vector<8x108xf32>
    %114 = vector.broadcast %112 : vector<8x1xf32> to vector<8x108xf32>
    %115 = arith.mulf %113, %114 : vector<8x108xf32>
    %cst_42 = arith.constant 9.99999974E-6 : f32
    %116 = vector.broadcast %cst_42 : f32 to vector<8x1xf32>
    %117 = arith.addf %109, %116 : vector<8x1xf32>
    %118 = math.rsqrt %117 : vector<8x1xf32>
    %119 = vector.broadcast %76 : vector<1x108xf32> to vector<8x108xf32>
    %120 = vector.broadcast %118 : vector<8x1xf32> to vector<8x108xf32>
    %121 = arith.mulf %119, %120 : vector<8x108xf32>
    %122 = arith.addf %115, %121 : vector<8x108xf32>
    %c8 = arith.constant 8 : index
    %c0_43 = arith.constant 0 : index
    %123 = vector.load %arg3[%c8, %c0_43] : memref<16x128xf32, #tpu.memory_space<vmem>>, vector<1x108xf32>
    %c9 = arith.constant 9 : index
    %c0_44 = arith.constant 0 : index
    %124 = vector.load %arg3[%c9, %c0_44] : memref<16x128xf32, #tpu.memory_space<vmem>>, vector<1x108xf32>
    %125 = arith.mulf %96, %122 : vector<8x108xf32>
    %126 = vector.broadcast %123 : vector<1x108xf32> to vector<8x108xf32>
    %127 = arith.mulf %125, %126 : vector<8x108xf32>
    %128 = vector.broadcast %124 : vector<1x108xf32> to vector<8x108xf32>
    %129 = arith.addf %127, %128 : vector<8x108xf32>
    %cst_45 = arith.constant 0.000000e+00 : f32
    %130 = vector.broadcast %cst_45 : f32 to vector<8x108xf32>
    %131 = arith.maximumf %129, %130 : vector<8x108xf32>
    %c168 = arith.constant 168 : index
    %c0_46 = arith.constant 0 : index
    %132 = vector.load %arg2[%c168, %c0_46] : memref<400x128xf32, #tpu.memory_space<vmem>>, vector<108x120xf32>
    %c10 = arith.constant 10 : index
    %c0_47 = arith.constant 0 : index
    %133 = vector.load %arg3[%c10, %c0_47] : memref<16x128xf32, #tpu.memory_space<vmem>>, vector<1x120xf32>
    %cst_48 = arith.constant dense<0.000000e+00> : vector<8x120xf32>
    %134 = tpu.matmul %131, %132, %cst_48 {dimension_numbers = #tpu.dot_dimension_numbers<[1], [0], [0], [1], [0, 0, 1, 1], [], []>, precision = #tpu.contract_precision<fp32>} : vector<8x108xf32>, vector<108x120xf32>, vector<8x120xf32> -> vector<8x120xf32>
    %135 = vector.broadcast %133 : vector<1x120xf32> to vector<8x120xf32>
    %136 = arith.addf %134, %135 : vector<8x120xf32>
    %137 = tpu.iota {dimensions = array<i32: 1>} : vector<1x120xi32>
    %c90_i32 = arith.constant 90 : i32
    %138 = vector.broadcast %c90_i32 : i32 to vector<1x120xi32>
    %139 = arith.cmpi slt, %137, %138 : vector<1x120xi32>
    %140 = arith.extui %139 : vector<1x120xi1> to vector<1x120xi32>
    %141 = arith.sitofp %140 : vector<1x120xi32> to vector<1x120xf32>
    %cst_49 = arith.constant 1.000000e+00 : f32
    %142 = vector.broadcast %cst_49 : f32 to vector<1x120xf32>
    %143 = arith.subf %142, %141 : vector<1x120xf32>
    %144 = vector.broadcast %141 : vector<1x120xf32> to vector<8x120xf32>
    %145 = arith.mulf %136, %144 : vector<8x120xf32>
    %cst_50 = arith.constant dense<0.000000e+00> : vector<8xf32>
    %146 = vector.multi_reduction <add>, %145, %cst_50 [1] : vector<8x120xf32> to vector<8xf32>
    %147 = vector.shape_cast %146 : vector<8xf32> to vector<8x1xf32>
    %148 = vector.broadcast %143 : vector<1x120xf32> to vector<8x120xf32>
    %149 = arith.mulf %136, %148 : vector<8x120xf32>
    %cst_51 = arith.constant dense<0.000000e+00> : vector<8xf32>
    %150 = vector.multi_reduction <add>, %149, %cst_51 [1] : vector<8x120xf32> to vector<8xf32>
    %151 = vector.shape_cast %150 : vector<8xf32> to vector<8x1xf32>
    %cst_52 = arith.constant 0.0111111114 : f32
    %152 = vector.broadcast %cst_52 : f32 to vector<8x1xf32>
    %153 = arith.mulf %147, %152 : vector<8x1xf32>
    %154 = vector.broadcast %141 : vector<1x120xf32> to vector<8x120xf32>
    %155 = vector.broadcast %153 : vector<8x1xf32> to vector<8x120xf32>
    %156 = arith.mulf %154, %155 : vector<8x120xf32>
    %cst_53 = arith.constant 0.0333333351 : f32
    %157 = vector.broadcast %cst_53 : f32 to vector<8x1xf32>
    %158 = arith.mulf %151, %157 : vector<8x1xf32>
    %159 = vector.broadcast %143 : vector<1x120xf32> to vector<8x120xf32>
    %160 = vector.broadcast %158 : vector<8x1xf32> to vector<8x120xf32>
    %161 = arith.mulf %159, %160 : vector<8x120xf32>
    %162 = arith.addf %156, %161 : vector<8x120xf32>
    %163 = arith.subf %136, %162 : vector<8x120xf32>
    %164 = arith.mulf %163, %163 : vector<8x120xf32>
    %165 = vector.broadcast %141 : vector<1x120xf32> to vector<8x120xf32>
    %166 = arith.mulf %164, %165 : vector<8x120xf32>
    %cst_54 = arith.constant dense<0.000000e+00> : vector<8xf32>
    %167 = vector.multi_reduction <add>, %166, %cst_54 [1] : vector<8x120xf32> to vector<8xf32>
    %168 = vector.shape_cast %167 : vector<8xf32> to vector<8x1xf32>
    %cst_55 = arith.constant 0.0111111114 : f32
    %169 = vector.broadcast %cst_55 : f32 to vector<8x1xf32>
    %170 = arith.mulf %168, %169 : vector<8x1xf32>
    %171 = vector.broadcast %143 : vector<1x120xf32> to vector<8x120xf32>
    %172 = arith.mulf %164, %171 : vector<8x120xf32>
    %cst_56 = arith.constant dense<0.000000e+00> : vector<8xf32>
    %173 = vector.multi_reduction <add>, %172, %cst_56 [1] : vector<8x120xf32> to vector<8xf32>
    %174 = vector.shape_cast %173 : vector<8xf32> to vector<8x1xf32>
    %cst_57 = arith.constant 0.0333333351 : f32
    %175 = vector.broadcast %cst_57 : f32 to vector<8x1xf32>
    %176 = arith.mulf %174, %175 : vector<8x1xf32>
    %cst_58 = arith.constant 9.99999974E-6 : f32
    %177 = vector.broadcast %cst_58 : f32 to vector<8x1xf32>
    %178 = arith.addf %170, %177 : vector<8x1xf32>
    %179 = math.rsqrt %178 : vector<8x1xf32>
    %180 = vector.broadcast %141 : vector<1x120xf32> to vector<8x120xf32>
    %181 = vector.broadcast %179 : vector<8x1xf32> to vector<8x120xf32>
    %182 = arith.mulf %180, %181 : vector<8x120xf32>
    %cst_59 = arith.constant 9.99999974E-6 : f32
    %183 = vector.broadcast %cst_59 : f32 to vector<8x1xf32>
    %184 = arith.addf %176, %183 : vector<8x1xf32>
    %185 = math.rsqrt %184 : vector<8x1xf32>
    %186 = vector.broadcast %143 : vector<1x120xf32> to vector<8x120xf32>
    %187 = vector.broadcast %185 : vector<8x1xf32> to vector<8x120xf32>
    %188 = arith.mulf %186, %187 : vector<8x120xf32>
    %189 = arith.addf %182, %188 : vector<8x120xf32>
    %c11 = arith.constant 11 : index
    %c0_60 = arith.constant 0 : index
    %190 = vector.load %arg3[%c11, %c0_60] : memref<16x128xf32, #tpu.memory_space<vmem>>, vector<1x120xf32>
    %c12 = arith.constant 12 : index
    %c0_61 = arith.constant 0 : index
    %191 = vector.load %arg3[%c12, %c0_61] : memref<16x128xf32, #tpu.memory_space<vmem>>, vector<1x120xf32>
    %192 = arith.mulf %163, %189 : vector<8x120xf32>
    %193 = vector.broadcast %190 : vector<1x120xf32> to vector<8x120xf32>
    %194 = arith.mulf %192, %193 : vector<8x120xf32>
    %195 = vector.broadcast %191 : vector<1x120xf32> to vector<8x120xf32>
    %196 = arith.addf %194, %195 : vector<8x120xf32>
    %cst_62 = arith.constant 0.000000e+00 : f32
    %197 = vector.broadcast %cst_62 : f32 to vector<8x120xf32>
    %198 = arith.maximumf %196, %197 : vector<8x120xf32>
    %c280 = arith.constant 280 : index
    %c0_63 = arith.constant 0 : index
    %199 = vector.load %arg2[%c280, %c0_63] : memref<400x128xf32, #tpu.memory_space<vmem>>, vector<120x16xf32>
    %c13 = arith.constant 13 : index
    %c0_64 = arith.constant 0 : index
    %200 = vector.load %arg3[%c13, %c0_64] : memref<16x128xf32, #tpu.memory_space<vmem>>, vector<1x16xf32>
    %cst_65 = arith.constant dense<0.000000e+00> : vector<8x16xf32>
    %201 = tpu.matmul %198, %199, %cst_65 {dimension_numbers = #tpu.dot_dimension_numbers<[1], [0], [0], [1], [0, 0, 1, 1], [], []>, precision = #tpu.contract_precision<fp32>} : vector<8x120xf32>, vector<120x16xf32>, vector<8x16xf32> -> vector<8x16xf32>
    %202 = vector.broadcast %200 : vector<1x16xf32> to vector<8x16xf32>
    %203 = arith.addf %201, %202 : vector<8x16xf32>
    %cst_66 = arith.constant dense<0xFF800000> : vector<8xf32>
    %204 = vector.multi_reduction <maximumf>, %203, %cst_66 [1] : vector<8x16xf32> to vector<8xf32>
    %205 = vector.shape_cast %204 : vector<8xf32> to vector<8x1xf32>
    %206 = vector.broadcast %205 : vector<8x1xf32> to vector<8x16xf32>
    %207 = arith.subf %203, %206 : vector<8x16xf32>
    %208 = math.exp %207 : vector<8x16xf32>
    %cst_67 = arith.constant dense<0.000000e+00> : vector<8xf32>
    %209 = vector.multi_reduction <add>, %208, %cst_67 [1] : vector<8x16xf32> to vector<8xf32>
    %210 = vector.shape_cast %209 : vector<8xf32> to vector<8x1xf32>
    %211 = vector.broadcast %210 : vector<8x1xf32> to vector<8x16xf32>
    %212 = arith.divf %208, %211 : vector<8x16xf32>
    %c0_68 = arith.constant 0 : index
    %c0_69 = arith.constant 0 : index
    %213 = vector.load %arg4[%c0_68, %c0_69] : memref<8x16xf32, #tpu.memory_space<vmem>>, vector<8x16xf32>
    tpu.vector_store %arg4[%c0_68, %c0_69], %212 {strides = array<i32>} : memref<8x16xf32, #tpu.memory_space<vmem>>, vector<8x16xf32>,
    %c14 = arith.constant 14 : index
    %c0_70 = arith.constant 0 : index
    %214 = vector.load %arg3[%c14, %c0_70] : memref<16x128xf32, #tpu.memory_space<vmem>>, vector<1x120xf32>
    %c15 = arith.constant 15 : index
    %c0_71 = arith.constant 0 : index
    %215 = vector.load %arg3[%c15, %c0_71] : memref<16x128xf32, #tpu.memory_space<vmem>>, vector<1x1xf32>
    %216 = vector.broadcast %214 : vector<1x120xf32> to vector<8x120xf32>
    %217 = arith.mulf %198, %216 : vector<8x120xf32>
    %cst_72 = arith.constant dense<0.000000e+00> : vector<8xf32>
    %218 = vector.multi_reduction <add>, %217, %cst_72 [1] : vector<8x120xf32> to vector<8xf32>
    %219 = vector.shape_cast %218 : vector<8xf32> to vector<8x1xf32>
    %220 = vector.broadcast %215 : vector<1x1xf32> to vector<8x1xf32>
    %221 = arith.addf %219, %220 : vector<8x1xf32>
    %c0_73 = arith.constant 0 : index
    %c0_74 = arith.constant 0 : index
    %222 = vector.load %arg6[%c0_73, %c0_74] : memref<8x1xf32, #tpu.memory_space<vmem>>, vector<8x1xf32>
    tpu.vector_store %arg6[%c0_73, %c0_74], %221 {strides = array<i32>} : memref<8x1xf32, #tpu.memory_space<vmem>>, vector<8x1xf32>,
    return
  }
  func.func @transform_0(%arg0: i32) -> (i32, i32) {
    %c0_i32 = arith.constant 0 : i32
    %c0_i32_0 = arith.constant 0 : i32
    return %arg0, %c0_i32 : i32, i32
  }
  func.func @transform_1(%arg0: i32) -> (i32, i32) {
    %c0_i32 = arith.constant 0 : i32
    %c0_i32_0 = arith.constant 0 : i32
    %c0_i32_1 = arith.constant 0 : i32
    return %c0_i32, %c0_i32_0 : i32, i32
  }
  func.func @transform_2(%arg0: i32) -> (i32, i32) {
    %c0_i32 = arith.constant 0 : i32
    %c0_i32_0 = arith.constant 0 : i32
    %c0_i32_1 = arith.constant 0 : i32
    return %c0_i32, %c0_i32_0 : i32, i32
  }
  func.func @transform_3(%arg0: i32) -> (i32, i32) {
    %c0_i32 = arith.constant 0 : i32
    %c0_i32_0 = arith.constant 0 : i32
    return %arg0, %c0_i32 : i32, i32
  }
  func.func @transform_4(%arg0: i32) -> (i32, i32) {
    %c0_i32 = arith.constant 0 : i32
    %c0_i32_0 = arith.constant 0 : i32
    return %arg0, %c0_i32 : i32, i32
  }
  func.func @transform_5(%arg0: i32) -> (i32, i32) {
    %c0_i32 = arith.constant 0 : i32
    %c0_i32_0 = arith.constant 0 : i32
    return %arg0, %c0_i32 : i32, i32
  }
}

</mosaic_0001>

<bundles_post_ra>
// kernel: tpu_custom_call.1
= control target key start
LH: loop header
LB: loop body
LE: loop exit
PB: predicated region body
PF: predicated region fallthrough
CT: control target
= control target key end

     0   :  { %11 = vsyncpa [#allocation3], 0  ;;  %s6350_s0 = inlined_call_operand.hbm [shape: f32[8,16], index: 0, kind: input, shape index: {}]   ;;  %s6351_s1 = inlined_call_operand.hbm [shape: f32[400,128], index: 1, kind: input, shape index: {}]   ;;  %s6352_s2 = inlined_call_operand.hbm [shape: f32[16,128], index: 2, kind: input, shape index: {}]   ;;  %s6353_s3 = inlined_call_operand.hbm [shape: f32[8,16], index: 3, kind: output, shape index: {0}]   ;;  %s6354_s4 = inlined_call_operand.hbm [shape: f32[8,8], index: 4, kind: output, shape index: {1}]   ;;  %s6355_s5 = inlined_call_operand.vmem [shape: f32[8,1], index: 5, kind: output, shape index: {2}]  }
   0x1   :  { %12 = vsyncpa [#allocation6], 0 }
   0x2   :  { %13 = vsyncpa [#allocation4], 0 }
   0x3   :  { %14 = vsyncpa [#allocation10], 0  ;;  %s5341_s18 = smov [#allocation5]   ;;  %s5223_s22 = scalar_lea.hbm %s6351_s1, 6400 }
   0x4   :  { %s30_s19 = sshll.u32 %s5341_s18, 4  ;;  %p5224_p0 = scmp.ne.s32.totalorder %s6351_s1, %s5223_s22  ;;  %s31_s19 = int_to_ptr.vmem [resolvable:$true] %s30_s19 }
   0x5   :  { %p5227_p1 = scmp.lt.u32.totalorder %s5223_s22, %s6351_s1 }
   0x7   :  { %p5229_p2 = pnand %p5227_p1, %p5224_p0 }
   0x9   :  { %5232 = shalt.err (!%p5229_p2)
}
   0xa   :  { %s5233_s27 = scalar_lea.vmem %s31_s19, 6400  ;;  %p5238_p4 = scmp.lt.s32.totalorder %s31_s19, %s31_s19 }
   0xb   :  { %p5234_p3 = scmp.ne.s32.totalorder %s31_s19, %s5233_s27  ;;  %p5239_p5 = scmp.lt.s32.totalorder %s5233_s27, %s5233_s27 }
   0xd   :  { %p5240_p6 = por %p5239_p5, %p5238_p4 }
   0xf   :  { %p5241_p7 = pnand %p5240_p6, %p5234_p3 }
  0x11   :  { %5244 = shalt.err (!%p5241_p7)
}
  0x12   :  { %s5342_s28 = smov 128   ;;  %s5343_s29 = smov 8  }
  0x13   :  { %36 = dma.hbm_to_vmem [thread:$0]  %s6351_s1, 6400, %s31_s19, [#allocation6], %s5342_s28, %s5342_s28, %s5343_s29  }
  0x14   :  { %s5344_s7 = smov [#allocation2]   ;;  %s5345_s9 = smov [#allocation7]  }
  0x15   :  { %s21_s8 = sshll.u32 %s5344_s7, 4  ;;  %s42_s10 = sshll.u32 %s5345_s9, 4  ;;  %s22_s8 = int_to_ptr.vmem [resolvable:$true] %s21_s8  ;;  %s43_s10 = int_to_ptr.vmem [resolvable:$true] %s42_s10 }
  0x16   :  { %s5245_s13 = scalar_lea.hbm %s6350_s0, 128 }
  0x17   :  { %p5246_p8 = scmp.ne.s32.totalorder %s6350_s0, %s5245_s13  ;;  %p5249_p9 = scmp.lt.u32.totalorder %s5245_s13, %s6350_s0 }
  0x19   :  { %p5251_p10 = pnand %p5249_p9, %p5246_p8 }
  0x1b   :  { %5254 = shalt.err (!%p5251_p10)
}
  0x1c   :  { %s5255_s1 = scalar_lea.vmem %s22_s8, 128  ;;  %p5260_p12 = scmp.lt.s32.totalorder %s22_s8, %s22_s8 }
  0x1d   :  { %p5256_p11 = scmp.ne.s32.totalorder %s22_s8, %s5255_s1  ;;  %p5261_p13 = scmp.lt.s32.totalorder %s5255_s1, %s5255_s1 }
  0x1f   :  { %p5262_p0 = por %p5261_p13, %p5260_p12 }
  0x21   :  { %p5263_p1 = pnand %p5262_p0, %p5256_p11 }
  0x23   :  { %5266 = shalt.err (!%p5263_p1)
}
  0x24   :  { %24 = dma.hbm_to_vmem [thread:$0]  %s6350_s0, 128, %s22_s8, [#allocation3]  }
  0x25   :  { %s5267_s22 = scalar_lea.hbm %s6352_s2, 256 }
  0x26   :  { %p5268_p2 = scmp.ne.s32.totalorder %s6352_s2, %s5267_s22  ;;  %p5271_p3 = scmp.lt.u32.totalorder %s5267_s22, %s6352_s2 }
  0x28   :  { %p5273_p4 = pnand %p5271_p3, %p5268_p2 }
  0x2a   :  { %5276 = shalt.err (!%p5273_p4)
}
  0x2b   :  { %s5277_s27 = scalar_lea.vmem %s43_s10, 256  ;;  %p5282_p6 = scmp.lt.s32.totalorder %s43_s10, %s43_s10 }
  0x2c   :  { %p5278_p5 = scmp.ne.s32.totalorder %s43_s10, %s5277_s27  ;;  %p5283_p7 = scmp.lt.s32.totalorder %s5277_s27, %s5277_s27 }
  0x2e   :  { %p5284_p8 = por %p5283_p7, %p5282_p6 }
  0x30   :  { %p5285_p9 = pnand %p5284_p8, %p5278_p5 }
  0x32   :  { %5288 = shalt.err (!%p5285_p9)
}
  0x33   :  { %48 = dma.hbm_to_vmem [thread:$0]  %s6352_s2, 256, %s43_s10, [#allocation6], %s5342_s28, %s5342_s28, %s5343_s29  }
  0x34   :  { %5333 = dma.done.wait [#allocation3], 128  }
  0x35   :  { %5334 = vsyncadd [#allocation3], 4294967168 }
  0x36   :  { %5335 = dma.done.wait [#allocation6], 6656  }
  0x37   :  { %5336 = vsyncadd [#allocation6], 4294960640  ;;  %v5346_v0 = vmov 0.0|0.0   ;;  %vm5347_vm0 = vmmov 0   ;;  %v5348_v1 = vmov 0.0   ;;  %vm66_vm1 = vcmask 130048  }
  0x38   :  { %4704 = vmatprep.subr.bf16.mxu0 %v5346_v0  ;;  %4004 = vmatprep.mubr.msk.f32.mxu0 %vm5347_vm0, %v5348_v1  ;;  %v59_v2 = vld [vmem:[#allocation5] sm:$0xff]  ;;  %v60_v3 = vld [vmem:[#allocation5 + $0x8] sm:$0xff]  ;;  %v58_v4 = vld [vmem:[#allocation2] sm:$0xff]  ;;  %vm531_vm2 = vcmask 736256   ;;  %vm577_vm3 = vcmask 1041408   ;;  %vm1172_vm4 = vcmask 392192  }
  0x39   :  { %4701 = vmatprep.subr.bf16.mxu1 %v5346_v0  ;;  %3997 = vmatprep.mubr.msk.f32.mxu1 %vm5347_vm0, %v5348_v1  ;;  %v71_v5 = vand.u32 4294901760, %v59_v2  ;;  %v74_v6 = vand.u32 4294901760, %v60_v3  ;;  %v68_v7 = vsel %vm66_vm1, %v58_v4, 0  ;;  %v3639_v27 = vld [vmem:[#allocation7] ss:$0 sm:$0xff]  ;;  %v558_v39 = vld [vmem:[#allocation5 + $0x18] sm:$0xff] }
  0x3a   :  { %v137_v8 = vand.u32 4294901760, %v68_v7  ;;  %v557_v38 = vld [vmem:[#allocation5 + $0x10] sm:$0xff]  ;;  %v585_v41 = vand.u32 4294901760, %v558_v39  ;;  %v5458_v44 = vld [vmem:[#allocation5 + $0x20] sm:$0xff]  ;;  %v5460_v45 = vld [vmem:[#allocation5 + $0x28] sm:$0xff]  ;;  %vm1723_vm5 = vcmask 64512  }
  0x3b   :  { %v149_v9 = vsub.f32 %v59_v2, %v71_v5  ;;  %v156_v10 = vsub.f32 %v60_v3, %v74_v6  ;;  %v4702_v11 = vpack.c.bf16 %v74_v6, %v71_v5  ;;  %v582_v40 = vand.u32 4294901760, %v557_v38  ;;  %v5482_v54 = vld [vmem:[#allocation5 + $0x30] sm:$0xff]  ;;  %v5484_v55 = vld [vmem:[#allocation5 + $0x38] sm:$0xff]  ;;  %v5502_v5 = vld [vmem:[#allocation5 + $0x40] sm:$0xff]  ;;  %s5349_s29 = smov [#allocation9]  }
  0x3c   :  { %v138_v12 = vsub.f32 %v68_v7, %v137_v8  ;;  %v5456_v43 = vsub.f32 %v558_v39, %v585_v41  ;;  %v588_v48 = vand.u32 4294901760, %v5458_v44  ;;  %v591_v49 = vand.u32 4294901760, %v5460_v45  ;;  %v5504_v6 = vld [vmem:[#allocation5 + $0x48] sm:$0xff]  ;;  %s3621_s6 = sshll.u32 %s5349_s29, 4  ;;  %s3622_s6 = int_to_ptr.vmem [resolvable:$true] %s3621_s6 }
  0x3d   :  { %v150_v13 = vand.u32 4294901760, %v149_v9  ;;  %v157_v14 = vand.u32 4294901760, %v156_v10  ;;  %4703 = vmatpush3.bf16.msra.mxu1 %v4702_v11  ;;  %v4708_v23 = vpack.c.bf16 %v156_v10, %v149_v9  ;;  %v5454_v42 = vsub.f32 %v557_v38, %v582_v40  ;;  %s5289_s7 = scalar_lea.vmem %s3622_s6, 128  ;;  %p5294_p11 = scmp.lt.s32.totalorder %s3622_s6, %s3622_s6 }
  0x3e   :  { %v139_v15 = vand.u32 4294901760, %v138_v12  ;;  %4737 = vmatprep.subr.bf16.mxu1 %v5346_v0  ;;  %v678_v47 = vand.u32 4294901760, %v5456_v43  ;;  %v5475_v52 = vsub.f32 %v5458_v44, %v588_v48  ;;  %v5480_v53 = vsub.f32 %v5460_v45, %v591_v49  ;;  %p5290_p10 = scmp.ne.s32.totalorder %s3622_s6, %s5289_s7  ;;  %p5295_p12 = scmp.lt.s32.totalorder %s5289_s7, %s5289_s7 }
  0x3f   :  { %v151_v16 = vsub.f32 %v149_v9, %v150_v13  ;;  %v158_v17 = vsub.f32 %v156_v10, %v157_v14  ;;  %v4714_v24 = vpack.c.bf16 %v157_v14, %v150_v13  ;;  %v671_v46 = vand.u32 4294901760, %v5454_v42 }
  0x40   :  { %v140_v18 = vsub.f32 %v138_v12, %v139_v15  ;;  %v679_v51 = vsub.f32 %v5456_v43, %v678_v47  ;;  %v685_v58 = vand.u32 4294901760, %v5475_v52  ;;  %v692_v59 = vand.u32 4294901760, %v5480_v53  ;;  %p5296_p13 = por %p5295_p12, %p5294_p11 }
  0x41   :  { %v152_v19 = vand.u32 4294901760, %v151_v16  ;;  %v159_v20 = vand.u32 4294901760, %v158_v17  ;;  %v672_v50 = vsub.f32 %v5454_v42, %v671_v46  ;;  %v594_v60 = vand.u32 4294901760, %v5482_v54 }
  0x42   :  { %v141_v21 = vand.u32 4294901760, %v140_v18  ;;  %v680_v57 = vand.u32 4294901760, %v679_v51  ;;  %v597_v61 = vand.u32 4294901760, %v5484_v55  ;;  %v686_v63 = vsub.f32 %v5475_v52, %v685_v58  ;;  %v565_v18 = vld [vmem:[#allocation5 + $0x50] sm:$0xff]  ;;  %p5297_p0 = pnand %p5296_p13, %p5290_p10 }
  0x43   :  { %v4705_v22 = vpack.c.bf16 %v159_v20, %v152_v19  ;;  %v673_v56 = vand.u32 4294901760, %v672_v50  ;;  %v693_v2 = vsub.f32 %v5480_v53, %v692_v59  ;;  %v5497_v3 = vsub.f32 %v5482_v54, %v594_v60  ;;  %v566_v19 = vld [vmem:[#allocation5 + $0x58] sm:$0xff] }
  0x44   :  { %3998 = vmatmul.mubr.f32.vlgmr.msra.gmra.mrb[0].mxu1 %v141_v21  ;;  %v5500_v4 = vsub.f32 %v5484_v55, %v597_v61  ;;  %v687_v7 = vand.u32 4294901760, %v686_v63  ;;  %v600_v9 = vand.u32 4294901760, %v5502_v5  ;;  %v603_v10 = vand.u32 4294901760, %v5504_v6 }
  0x45   :  { %4706 = vmatpush3.bf16.msra.mxu0 %v4705_v22  ;;  %4086 = vmatprep.mubr.msk.f32.mxu1 %vm5347_vm0, %v5348_v1  ;;  %v4738_v62 = vpack.c.bf16 %v680_v57, %v673_v56  ;;  %v606_v22 = vand.u32 4294901760, %v565_v18  ;;  %v5553_v55 = vpack.c.bf16 %v591_v49, %v588_v48  ;;  %vm2187_vm7 = vcmask 883712  }
  0x46   :  { %4707 = vmatprep.subr.bf16.mxu0 %v5346_v0  ;;  %v5512_v14 = vsub.f32 %v5502_v5, %v600_v9  ;;  %vm2255_vm8 = vcmask 1043456   ;;  %vm2879_vm10 = vcmask 982016   ;;  %vm3603_vm11 = vcmask 7168  }
  0x47   :  { %4739 = vmatpush3.bf16.msra.mxu1 %v4738_v62 }
  0x48   :  { %4005 = vmatmul.mubr.f32.vlgmr.msra.gmra.mrb[0].mxu0 %v137_v8  ;;  %4740 = vmatprep.subr.bf16.mxu1 %v5346_v0  ;;  %v713_v20 = vand.u32 4294901760, %v5512_v14 }
  0x49   :  { %4709 = vmatpush3.bf16.msra.mxu0 %v4708_v23  ;;  %4011 = vmatprep.mubr.msk.f32.mxu0 %vm5347_vm0, %v5348_v1  ;;  %v609_v23 = vand.u32 4294901760, %v566_v19 }
  0x4a   :  { %4710 = vmatprep.subr.bf16.mxu0 %v5346_v0 }
  0x50   :  { %4012 = vmatmul.mubr.f32.vlgmr.msra.gmra.mrb[0].mxu0 %v138_v12  ;;  %v706_v12 = vand.u32 4294901760, %v5500_v4 }
  0x51   :  { %4712 = vmatpush3.bf16.msra.mxu0 %v4702_v11  ;;  %4018 = vmatprep.mubr.msk.f32.mxu0 %vm5347_vm0, %v5348_v1 }
  0x52   :  { %4713 = vmatprep.subr.bf16.mxu0 %v5346_v0  ;;  %v707_v17 = vsub.f32 %v5500_v4, %v706_v12 }
  0x58   :  { %4019 = vmatmul.mubr.f32.vlgmr.msra.gmra.mrb[0].mxu0 %v139_v15  ;;  %v5515_v15 = vsub.f32 %v5504_v6, %v603_v10 }
  0x59   :  { %4715 = vmatpush3.bf16.msra.mxu0 %v4714_v24  ;;  %4025 = vmatprep.mubr.msk.f32.mxu0 %vm5347_vm0, %v5348_v1 }
  0x5a   :  { %4716 = vmatprep.subr.bf16.mxu0 %v5346_v0  ;;  %v720_v21 = vand.u32 4294901760, %v5515_v15 }
  0x60   :  { %4026 = vmatmul.mubr.f32.vlgmr.msra.gmra.mrb[0].mxu0 %v137_v8 }
  0x61   :  { %4718 = vmatpush3.bf16.msra.mxu0 %v4702_v11  ;;  %4032 = vmatprep.mubr.msk.f32.mxu0 %vm5347_vm0, %v5348_v1  ;;  %v699_v11 = vand.u32 4294901760, %v5497_v3 }
  0x62   :  { %4719 = vmatprep.subr.bf16.mxu0 %v5346_v0 }
  0x63   :  { %v700_v16 = vsub.f32 %v5497_v3, %v699_v11 }
  0x65   :  { %v701_v24 = vand.u32 4294901760, %v700_v16  ;;  %v4762_v16 = vpack.c.bf16 %v5500_v4, %v5497_v3 }
  0x68   :  { %4033 = vmatmul.mubr.f32.vlgmr.msra.gmra.mrb[0].mxu0 %v137_v8  ;;  %v694_v8 = vand.u32 4294901760, %v693_v2  ;;  %v5560_v2 = vpack.c.bf16 %v597_v61, %v594_v60  ;;  %v5573_v61 = vpack.c.bf16 %v603_v10, %v600_v9  ;;  %v4759_v9 = vpack.c.bf16 %v5480_v53, %v5475_v52 }
  0x69   :  { %4059 = vmatprep.mubr.msk.f32.mxu0 %vm5347_vm0, %v5348_v1 }
  0x6a   :  { %v4741_v13 = vpack.c.bf16 %v694_v8, %v687_v7  ;;  %v4756_v8 = vpack.c.bf16 %v5456_v43, %v5454_v42  ;;  %v4798_v42 = vpack.c.bf16 %v706_v12, %v699_v11  ;;  %v4801_v43 = vpack.c.bf16 %v720_v21, %v713_v20 }
  0x6c   :  { %4742 = vmatpush3.bf16.msra.mxu1 %v4741_v13  ;;  %v5582_v13 = vpack.c.bf16 %v609_v23, %v606_v22 }
  0x6d   :  { %4743 = vmatprep.subr.bf16.mxu1 %v5346_v0 }
 0x117   :  { %v143_v25 = vpop.f32.mrb[0].mxu1 }
 0x118   :  { %v3999_v26 = vpop.f32.mrb[1].mxu1  ;;  %v144_v28 = vadd.f32 %v3639_v27, %v143_v25  ;;  %v708_v25 = vand.u32 4294901760, %v707_v17  ;;  %v721_v27 = vsub.f32 %v5515_v15, %v720_v21  ;;  %v4765_v17 = vpack.c.bf16 %v5515_v15, %v5512_v14 }
 0x119   :  { %v714_v26 = vsub.f32 %v5512_v14, %v713_v20 }
 0x13b   :  { %v525_v29 = vpop.f32.mrb[0].mxu0 }
 0x13c   :  { %v5134_v30 = vadd.f32 %v525_v29, %v144_v28  ;;  %v4034_v31 = vpop.f32.mrb[1].mxu0  ;;  %v5532_v28 = vsub.f32 %v565_v18, %v606_v22  ;;  %v5534_v29 = vsub.f32 %v566_v19, %v609_v23 }
 0x13d   :  { %v4744_v31 = vpack.c.bf16 %v708_v25, %v701_v24 }
 0x13e   :  { %v532_v32 = vsel %vm531_vm2, %v5134_v30, 0.0  ;;  %v734_v38 = vand.u32 4294901760, %v5534_v29  ;;  %v4768_v18 = vpack.c.bf16 %v5534_v29, %v5532_v28 }
 0x13f   :  { %533 = vadd.xlane.f32.xlu0 %v532_v32  ;;  %v5536_v32 = vpack.c.bf16 %v585_v41, %v582_v40  ;;  %4745 = vmatpush3.bf16.msra.mxu1 %v4744_v31 }
 0x140   :  { %4746 = vmatprep.subr.bf16.mxu1 %v5346_v0  ;;  %v735_v41 = vsub.f32 %v5534_v29, %v734_v38  ;;  %v1198_v29 = vld [vmem:[#allocation5 + $0x70] sm:$0xff] }
 0x141   :  { %4721 = vmatpush3.bf16.msra.mxu0 %v5536_v32 }
 0x142   :  { %4722 = vmatprep.subr.bf16.mxu0 %v5346_v0  ;;  %v736_v62 = vand.u32 4294901760, %v735_v41  ;;  %v4792_v41 = vpack.c.bf16 %v678_v47, %v671_v46 }
 0x145   :  { %4724 = vmatpush3.bf16.msra.mxu0 %v5553_v55 }
 0x146   :  { %4725 = vmatprep.subr.bf16.mxu0 %v5346_v0 }
 0x149   :  { %4727 = vmatpush3.bf16.msra.mxu0 %v5560_v2 }
 0x14a   :  { %4728 = vmatprep.subr.bf16.mxu0 %v5346_v0 }
 0x14d   :  { %4730 = vmatpush3.bf16.msra.mxu0 %v5573_v61 }
 0x14e   :  { %4731 = vmatprep.subr.bf16.mxu0 %v5346_v0 }
 0x151   :  { %4733 = vmatpush3.bf16.msra.mxu0 %v5582_v13 }
 0x152   :  { %4734 = vmatprep.subr.bf16.mxu0 %v5346_v0 }
 0x1cc   :  { %v534_v33 = vpop.xlane.xlu0 %533 }
 0x1cd   :  { %v536_v34 = vmul.f32 0.011111111, %v534_v33  ;;  %v567_v33 = vld [vmem:[#allocation5 + $0x60] sm:$0xff] }
 0x1ce   :  { %v612_v50 = vand.u32 4294901760, %v567_v33 }
 0x1cf   :  { %v5449_v35 = vsub.f32 %v5134_v30, %v536_v34  ;;  %v568_v30 = vld [vmem:[#allocation5 + $0x68] sm:$0x3]  ;;  %v715_v34 = vand.u32 4294901760, %v714_v26  ;;  %v3640_v26 = vld [vmem:[#allocation7 + $0x1] ss:$0 sm:$0xff] }
 0x1d0   :  { %v579_v39 = vsel %vm577_vm3, %v568_v30, 0  ;;  %v5555_v56 = vsub.f32 %v567_v33, %v612_v50  ;;  %v3641_v30 = vld [vmem:[#allocation7 + $0x2] ss:$0 sm:$0xff] }
 0x1d1   :  { %v538_v36 = vmul.f32 %v5449_v35, %v5449_v35  ;;  %v615_v54 = vand.u32 4294901760, %v579_v39 }
 0x1d2   :  { %v741_v5 = vand.u32 4294901760, %v5555_v56 }
 0x1d3   :  { %v539_v37 = vsel %vm531_vm2, %v538_v36, 0.0  ;;  %v722_v36 = vand.u32 4294901760, %v721_v27  ;;  %v5557_v63 = vsub.f32 %v579_v39, %v615_v54  ;;  %v5588_v10 = vpack.c.bf16 %v615_v54, %v612_v50 }
 0x1d4   :  { %540 = vadd.xlane.f32.xlu0 %v539_v37  ;;  %v727_v37 = vand.u32 4294901760, %v5532_v28  ;;  %v742_v48 = vsub.f32 %v5555_v56, %v741_v5  ;;  %v4795_v54 = vpack.c.bf16 %v692_v59, %v685_v58  ;;  %v3642_v58 = vld [vmem:[#allocation7 + $0x3] ss:$0 sm:$0xff] }
 0x1d5   :  { %v4747_v51 = vpack.c.bf16 %v722_v36, %v715_v34  ;;  %v748_v45 = vand.u32 4294901760, %v5557_v63  ;;  %4736 = vmatpush3.bf16.msra.mxu0 %v5588_v10  ;;  %v4771_v19 = vpack.c.bf16 %v5557_v63, %v5555_v56  ;;  %v1201_v56 = vld [vmem:[#allocation5 + $0x88] sm:$0xff] }
 0x1d6   :  { %v728_v40 = vsub.f32 %v5532_v28, %v727_v37  ;;  %v743_v60 = vand.u32 4294901760, %v742_v48  ;;  %4827 = vmatprep.subr.bf16.mxu0 %v5346_v0  ;;  %v4804_v46 = vpack.c.bf16 %v734_v38, %v727_v37  ;;  %v1200_v37 = vld [vmem:[#allocation5 + $0x80] sm:$0xff]  ;;  %v1213_v38 = vand.u32 4294901760, %v1198_v29 }
 0x1d7   :  { %4748 = vmatpush3.bf16.msra.mxu1 %v4747_v51  ;;  %v749_v49 = vsub.f32 %v5557_v63, %v748_v45  ;;  %v4807_v47 = vpack.c.bf16 %v748_v45, %v741_v5  ;;  %v1203_v63 = vld [vmem:[#allocation5 + $0x98] sm:$0xff] }
 0x1d8   :  { %v729_v57 = vand.u32 4294901760, %v728_v40  ;;  %4749 = vmatprep.subr.bf16.mxu1 %v5346_v0  ;;  %v5688_v48 = vsub.f32 %v1198_v29, %v1213_v38 }
 0x1d9   :  { %v750_v6 = vand.u32 4294901760, %v749_v49 }
 0x1da   :  { %v4750_v44 = vpack.c.bf16 %v736_v62, %v729_v57  ;;  %v1219_v57 = vand.u32 4294901760, %v1200_v37  ;;  %v1202_v62 = vld [vmem:[#allocation5 + $0x90] sm:$0xff] }
 0x1db   :  { %v4753_v7 = vpack.c.bf16 %v750_v6, %v743_v60  ;;  %v1225_v5 = vand.u32 4294901760, %v1202_v62 }
 0x1dc   :  { %4751 = vmatpush3.bf16.msra.mxu1 %v4750_v44  ;;  %v1228_v44 = vand.u32 4294901760, %v1203_v63  ;;  %v5692_v60 = vsub.f32 %v1200_v37, %v1219_v57 }
 0x1dd   :  { %4752 = vmatprep.subr.bf16.mxu1 %v5346_v0  ;;  %v5696_v6 = vsub.f32 %v1202_v62, %v1225_v5 }
 0x1e0   :  { %4754 = vmatpush3.bf16.msra.mxu1 %v4753_v7 }
 0x1e1   :  { %4755 = vmatprep.subr.bf16.mxu1 %v5346_v0 }
 0x261   :  { %v541_v22 = vpop.xlane.xlu0 %540 }
 0x262   :  { %v542_v23 = vmul.f32 0.011111111, %v541_v22  ;;  %v1310_v22 = vand.u32 4294901760, %v5692_v60 }
 0x264   :  { %v543_v24 = vadd.f32 1e-05, %v542_v23 }
 0x266   :  { %5207 = vrsqrt.f32 %v543_v24 }
 0x270   :  { %v5208_v25 = vpop.eup %5207 }
 0x271   :  { %v545_v27 = vmul.f32 %v5208_v25, %v5449_v35  ;;  %v1311_v25 = vsub.f32 %v5692_v60, %v1310_v22 }
 0x273   :  { %v550_v31 = vmul.f32 %v3640_v26, %v545_v27  ;;  %v1312_v27 = vand.u32 4294901760, %v1311_v25 }
 0x275   :  { %v555_v33 = vadd.f32 %v3641_v30, %v550_v31  ;;  %v1324_v31 = vand.u32 4294901760, %v5696_v6 }
 0x277   :  { %v556_v34 = vmax.f32 %v555_v33, 0.0 }
 0x279   :  { %v575_v36 = vsel %vm531_vm2, %v556_v34, 0 }
 0x27a   :  { %v5602_v39 = vand.u32 4294901760, %v575_v36 }
 0x27c   :  { %v659_v50 = vsub.f32 %v575_v36, %v5602_v39  ;;  %4087 = vmatmul.mubr.f32.vlgmr.msra.gmra.mrb[2].mxu1 %v5602_v39  ;;  %v1325_v36 = vsub.f32 %v5696_v6, %v1324_v31 }
 0x27d   :  { %4757 = vmatpush3.bf16.msra.mxu1 %v4756_v8  ;;  %4113 = vmatprep.mubr.msk.f32.mxu1 %vm5347_vm0, %v5348_v1  ;;  %v5701_v8 = vsub.f32 %v1203_v63, %v1228_v44 }
 0x27e   :  { %4758 = vmatprep.subr.bf16.mxu1 %v5346_v0  ;;  %v660_v51 = vand.u32 4294901760, %v659_v50 }
 0x27f   :  { %v1331_v33 = vand.u32 4294901760, %v5701_v8 }
 0x280   :  { %v661_v35 = vsub.f32 %v659_v50, %v660_v51 }
 0x281   :  { %4760 = vmatpush3.bf16.msra.mxu1 %v4759_v9  ;;  %v1296_v9 = vand.u32 4294901760, %v5688_v48 }
 0x282   :  { %4761 = vmatprep.subr.bf16.mxu1 %v5346_v0  ;;  %v662_v40 = vand.u32 4294901760, %v661_v35 }
 0x284   :  { %4060 = vmatmul.mubr.f32.vlgmr.msra.gmra.mrb[2].mxu0 %v662_v40 }
 0x285   :  { %4763 = vmatpush3.bf16.msra.mxu1 %v4762_v16  ;;  %4209 = vmatprep.mubr.msk.f32.mxu0 %vm5347_vm0, %v5348_v1  ;;  %v1297_v16 = vsub.f32 %v5688_v48, %v1296_v9 }
 0x286   :  { %4764 = vmatprep.subr.bf16.mxu1 %v5346_v0 }
 0x289   :  { %4766 = vmatpush3.bf16.msra.mxu1 %v4765_v17 }
 0x28a   :  { %4767 = vmatprep.subr.bf16.mxu1 %v5346_v0 }
 0x28d   :  { %4769 = vmatpush3.bf16.msra.mxu1 %v4768_v18  ;;  %v1298_v18 = vand.u32 4294901760, %v1297_v16 }
 0x28e   :  { %4770 = vmatprep.subr.bf16.mxu1 %v5346_v0 }
 0x291   :  { %4772 = vmatpush3.bf16.msra.mxu1 %v4771_v19 }
 0x292   :  { %4773 = vmatprep.subr.bf16.mxu1 %v5346_v0 }
 0x294   :  { %4114 = vmatmul.mubr.f32.vlgmr.msra.gmra.mrb[2].mxu1 %v659_v50  ;;  %v1326_v50 = vand.u32 4294901760, %v1325_v36 }
 0x295   :  { %4775 = vmatpush3.bf16.msra.mxu1 %v5536_v32  ;;  %4140 = vmatprep.mubr.msk.f32.mxu1 %vm5347_vm0, %v5348_v1 }
 0x296   :  { %4776 = vmatprep.subr.bf16.mxu1 %v5346_v0 }
 0x299   :  { %4778 = vmatpush3.bf16.msra.mxu1 %v5553_v55 }
 0x29a   :  { %4779 = vmatprep.subr.bf16.mxu1 %v5346_v0 }
 0x29d   :  { %4781 = vmatpush3.bf16.msra.mxu1 %v5560_v2 }
 0x29e   :  { %4782 = vmatprep.subr.bf16.mxu1 %v5346_v0 }
 0x2a1   :  { %4784 = vmatpush3.bf16.msra.mxu1 %v5573_v61 }
 0x2a2   :  { %4785 = vmatprep.subr.bf16.mxu1 %v5346_v0 }
 0x2a5   :  { %4787 = vmatpush3.bf16.msra.mxu1 %v5582_v13 }
 0x2a6   :  { %4788 = vmatprep.subr.bf16.mxu1 %v5346_v0 }
 0x2a9   :  { %4790 = vmatpush3.bf16.msra.mxu1 %v5588_v10 }
 0x2aa   :  { %4791 = vmatprep.subr.bf16.mxu1 %v5346_v0 }
 0x2ac   :  { %4141 = vmatmul.mubr.f32.vlgmr.msra.gmra.mrb[2].mxu1 %v660_v51 }
 0x2ad   :  { %4793 = vmatpush3.bf16.msra.mxu1 %v4792_v41  ;;  %4167 = vmatprep.mubr.msk.f32.mxu1 %vm5347_vm0, %v5348_v1 }
 0x2ae   :  { %4794 = vmatprep.subr.bf16.mxu1 %v5346_v0 }
 0x2b1   :  { %4796 = vmatpush3.bf16.msra.mxu1 %v4795_v54  ;;  %v4852_v54 = vpack.c.bf16 %v5701_v8, %v5696_v6 }
 0x2b2   :  { %4797 = vmatprep.subr.bf16.mxu1 %v5346_v0 }
 0x2b5   :  { %4799 = vmatpush3.bf16.msra.mxu1 %v4798_v42 }
 0x2b6   :  { %4800 = vmatprep.subr.bf16.mxu1 %v5346_v0 }
 0x2b9   :  { %4802 = vmatpush3.bf16.msra.mxu1 %v4801_v43 }
 0x2ba   :  { %4803 = vmatprep.subr.bf16.mxu1 %v5346_v0 }
 0x2bd   :  { %4805 = vmatpush3.bf16.msra.mxu1 %v4804_v46  ;;  %v4870_v46 = vpack.c.bf16 %v1331_v33, %v1324_v31 }
 0x2be   :  { %4806 = vmatprep.subr.bf16.mxu1 %v5346_v0 }
 0x2c1   :  { %4808 = vmatpush3.bf16.msra.mxu1 %v4807_v47 }
 0x2c2   :  { %4809 = vmatprep.subr.bf16.mxu1 %v5346_v0 }
 0x2c4   :  { %4168 = vmatmul.mubr.f32.vlgmr.msra.gmra.mrb[2].mxu1 %v5602_v39 }
 0x2c5   :  { %4811 = vmatpush3.bf16.msra.mxu1 %v5536_v32  ;;  %4194 = vmatprep.mubr.msk.f32.mxu1 %vm5347_vm0, %v5348_v1  ;;  %v1199_v32 = vld [vmem:[#allocation5 + $0x78] sm:$0xff] }
 0x2c6   :  { %4812 = vmatprep.subr.bf16.mxu1 %v5346_v0 }
 0x2c9   :  { %4814 = vmatpush3.bf16.msra.mxu1 %v5553_v55  ;;  %v1216_v55 = vand.u32 4294901760, %v1199_v32 }
 0x2ca   :  { %4815 = vmatprep.subr.bf16.mxu1 %v5346_v0 }
 0x2cb   :  { %v5686_v45 = vpack.c.bf16 %v1216_v55, %v1213_v38  ;;  %v5690_v49 = vsub.f32 %v1199_v32, %v1216_v55  ;;  %v3645_v55 = vld [vmem:[#allocation7 + $0x6] ss:$0 sm:$0xff] }
 0x2cd   :  { %4817 = vmatpush3.bf16.msra.mxu1 %v5560_v2  ;;  %v1222_v2 = vand.u32 4294901760, %v1201_v56  ;;  %4829 = vmatpush3.bf16.msra.mxu0 %v5686_v45  ;;  %v4846_v40 = vpack.c.bf16 %v5690_v49, %v5688_v48 }
 0x2ce   :  { %4818 = vmatprep.subr.bf16.mxu1 %v5346_v0  ;;  %4830 = vmatprep.subr.bf16.mxu0 %v5346_v0 }
 0x2cf   :  { %v5699_v7 = vpack.c.bf16 %v1222_v2, %v1219_v57 }
 0x2d1   :  { %4820 = vmatpush3.bf16.msra.mxu1 %v5573_v61  ;;  %v5694_v61 = vsub.f32 %v1201_v56, %v1222_v2  ;;  %4832 = vmatpush3.bf16.msra.mxu0 %v5699_v7 }
 0x2d2   :  { %4821 = vmatprep.subr.bf16.mxu1 %v5346_v0  ;;  %4833 = vmatprep.subr.bf16.mxu0 %v5346_v0 }
 0x2d3   :  { %v1317_v23 = vand.u32 4294901760, %v5694_v61  ;;  %v4849_v41 = vpack.c.bf16 %v5694_v61, %v5692_v60 }
 0x2d5   :  { %4823 = vmatpush3.bf16.msra.mxu1 %v5582_v13  ;;  %v5705_v13 = vpack.c.bf16 %v1228_v44, %v1225_v5  ;;  %v1318_v26 = vsub.f32 %v5694_v61, %v1317_v23  ;;  %v4867_v43 = vpack.c.bf16 %v1317_v23, %v1310_v22 }
 0x2d6   :  { %4824 = vmatprep.subr.bf16.mxu1 %v5346_v0 }
 0x2d7   :  { %4835 = vmatpush3.bf16.msra.mxu0 %v5705_v13  ;;  %v1319_v30 = vand.u32 4294901760, %v1318_v26 }
 0x2d8   :  { %4836 = vmatprep.subr.bf16.mxu0 %v5346_v0 }
 0x2d9   :  { %4826 = vmatpush3.bf16.msra.mxu1 %v5588_v10  ;;  %v1303_v10 = vand.u32 4294901760, %v5690_v49  ;;  %v4840_v34 = vpack.c.bf16 %v1319_v30, %v1312_v27 }
 0x2da   :  { %5007 = vmatprep.subr.bf16.mxu1 %v5346_v0 }
 0x2db   :  { %v1304_v17 = vsub.f32 %v5690_v49, %v1303_v10  ;;  %v4864_v42 = vpack.c.bf16 %v1303_v10, %v1296_v9  ;;  %v3646_v9 = vld [vmem:[#allocation7 + $0x7] ss:$0 sm:$0xff] }
 0x2dc   :  { %4195 = vmatmul.mubr.f32.vlgmr.msra.gmra.mrb[2].mxu1 %v5602_v39  ;;  %v1332_v39 = vsub.f32 %v5701_v8, %v1331_v33 }
 0x2dd   :  { %4533 = vmatprep.mubr.msk.f32.mxu1 %vm5347_vm0, %v5348_v1  ;;  %v1305_v19 = vand.u32 4294901760, %v1304_v17 }
 0x2de   :  { %v1333_v51 = vand.u32 4294901760, %v1332_v39 }
 0x2df   :  { %v4837_v24 = vpack.c.bf16 %v1305_v19, %v1298_v18 }
 0x2e0   :  { %v4843_v35 = vpack.c.bf16 %v1333_v51, %v1326_v50 }
 0x357   :  { %v664_v52 = vpop.f32.mrb[2].mxu0 }
 0x358   :  { %v4061_v53 = vpop.f32.mrb[3].mxu0  ;;  %v665_v59 = vadd.f32 %v3642_v58, %v664_v52 }
 0x3af   :  { %v1166_v3 = vpop.f32.mrb[2].mxu1 }
 0x3b0   :  { %v5136_v4 = vadd.f32 %v1166_v3, %v665_v59  ;;  %v4196_v11 = vpop.f32.mrb[3].mxu1  ;;  %v3643_v59 = vld [vmem:[#allocation7 + $0x4] ss:$0 sm:$0xff] }
 0x3b2   :  { %v1173_v12 = vsel %vm1172_vm4, %v5136_v4, 0.0 }
 0x3b3   :  { %1174 = vadd.xlane.f32.xlu1 %v1173_v12 }
 0x440   :  { %v1175_v14 = vpop.xlane.xlu1 %1174 }
 0x441   :  { %v1177_v15 = vmul.f32 0.020833334, %v1175_v14 }
 0x443   :  { %v5681_v20 = vsub.f32 %v5136_v4, %v1177_v15  ;;  %v3644_v4 = vld [vmem:[#allocation7 + $0x5] ss:$0 sm:$0xff] }
 0x445   :  { %v1179_v21 = vmul.f32 %v5681_v20, %v5681_v20 }
 0x447   :  { %v1180_v28 = vsel %vm1172_vm4, %v1179_v21, 0.0 }
 0x448   :  { %1181 = vadd.xlane.f32.xlu1 %v1180_v28 }
 0x4d5   :  { %v1182_v47 = vpop.xlane.xlu1 %1181 }
 0x4d6   :  { %v1183_v52 = vmul.f32 0.020833334, %v1182_v47  ;;  %v2235_v47 = vld [vmem:[#allocation5 + $0xb8] sm:$0xff] }
 0x4d8   :  { %v1184_v53 = vadd.f32 1e-05, %v1183_v52  ;;  %v2236_v52 = vld [vmem:[#allocation5 + $0xc0] sm:$0xff] }
 0x4da   :  { %5209 = vrsqrt.f32 %v1184_v53  ;;  %v2266_v53 = vand.u32 4294901760, %v2235_v47 }
 0x4e4   :  { %v5210_v58 = vpop.eup %5209 }
 0x4e5   :  { %v1186_v3 = vmul.f32 %v5210_v58, %v5681_v20  ;;  %v1725_v20 = vld [vmem:[#allocation5 + $0xa0] sm:$0xff]  ;;  %v2269_v58 = vand.u32 4294901760, %v2236_v52 }
 0x4e6   :  { %v1735_v38 = vand.u32 4294901760, %v1725_v20 }
 0x4e7   :  { %v1191_v11 = vmul.f32 %v3643_v59, %v1186_v3  ;;  %v5808_v59 = vpack.c.bf16 %v2269_v58, %v2266_v53  ;;  %v2237_v3 = vld [vmem:[#allocation5 + $0xc8] sm:$0xff] }
 0x4e8   :  { %v1812_v56 = vsub.f32 %v1725_v20, %v1735_v38  ;;  %v5819_v20 = vsub.f32 %v2235_v47, %v2266_v53 }
 0x4e9   :  { %v1196_v12 = vadd.f32 %v3644_v4, %v1191_v11  ;;  %v2238_v4 = vld [vmem:[#allocation5 + $0xd0] sm:$0xff]  ;;  %v2272_v11 = vand.u32 4294901760, %v2237_v3 }
 0x4ea   :  { %v1813_v5 = vand.u32 4294901760, %v1812_v56 }
 0x4eb   :  { %v1197_v14 = vmax.f32 %v1196_v12, 0.0  ;;  %v2275_v12 = vand.u32 4294901760, %v2238_v4 }
 0x4ec   :  { %v1814_v48 = vsub.f32 %v1812_v56, %v1813_v5 }
 0x4ed   :  { %v1210_v15 = vsel %vm1172_vm4, %v1197_v14, 0  ;;  %v5812_v14 = vpack.c.bf16 %v2275_v12, %v2272_v11 }
 0x4ee   :  { %v1283_v21 = vand.u32 4294901760, %v1210_v15  ;;  %v1815_v61 = vand.u32 4294901760, %v1814_v48 }
 0x4f0   :  { %v1284_v28 = vsub.f32 %v1210_v15, %v1283_v21  ;;  %v2239_v15 = vld [vmem:[#allocation5 + $0xd8] sm:$0xff] }
 0x4f2   :  { %v1285_v29 = vand.u32 4294901760, %v1284_v28 }
 0x4f4   :  { %v1286_v32 = vsub.f32 %v1284_v28, %v1285_v29 }
 0x4f6   :  { %v1287_v37 = vand.u32 4294901760, %v1286_v32 }
 0x4f8   :  { %4210 = vmatmul.mubr.f32.vlgmr.msra.gmra.mrb[4].mxu0 %v1287_v37 }
 0x4f9   :  { %4838 = vmatpush3.bf16.msra.mxu0 %v4837_v24  ;;  %4224 = vmatprep.mubr.msk.f32.mxu0 %vm5347_vm0, %v5348_v1 }
 0x4fa   :  { %4839 = vmatprep.subr.bf16.mxu0 %v5346_v0 }
 0x4fd   :  { %4841 = vmatpush3.bf16.msra.mxu0 %v4840_v34 }
 0x4fe   :  { %4842 = vmatprep.subr.bf16.mxu0 %v5346_v0 }
 0x501   :  { %4844 = vmatpush3.bf16.msra.mxu0 %v4843_v35 }
 0x502   :  { %4845 = vmatprep.subr.bf16.mxu0 %v5346_v0 }
 0x504   :  { %4225 = vmatmul.mubr.f32.vlgmr.msra.gmra.mrb[4].mxu0 %v1283_v21 }
 0x505   :  { %4847 = vmatpush3.bf16.msra.mxu0 %v4846_v40  ;;  %4239 = vmatprep.mubr.msk.f32.mxu0 %vm5347_vm0, %v5348_v1 }
 0x506   :  { %4848 = vmatprep.subr.bf16.mxu0 %v5346_v0 }
 0x509   :  { %4850 = vmatpush3.bf16.msra.mxu0 %v4849_v41  ;;  %v2233_v41 = vld [vmem:[#allocation5 + $0xa8] sm:$0xff] }
 0x50a   :  { %4851 = vmatprep.subr.bf16.mxu0 %v5346_v0 }
 0x50d   :  { %4853 = vmatpush3.bf16.msra.mxu0 %v4852_v54  ;;  %v2234_v54 = vld [vmem:[#allocation5 + $0xb0] sm:$0xff] }
 0x50e   :  { %4854 = vmatprep.subr.bf16.mxu0 %v5346_v0 }
 0x510   :  { %4240 = vmatmul.mubr.f32.vlgmr.msra.gmra.mrb[4].mxu0 %v1284_v28  ;;  %v2278_v28 = vand.u32 4294901760, %v2239_v15 }
 0x511   :  { %4856 = vmatpush3.bf16.msra.mxu0 %v5686_v45  ;;  %4254 = vmatprep.mubr.msk.f32.mxu0 %vm5347_vm0, %v5348_v1 }
 0x512   :  { %4857 = vmatprep.subr.bf16.mxu0 %v5346_v0 }
 0x515   :  { %4859 = vmatpush3.bf16.msra.mxu0 %v5699_v7 }
 0x516   :  { %4860 = vmatprep.subr.bf16.mxu0 %v5346_v0 }
 0x519   :  { %4862 = vmatpush3.bf16.msra.mxu0 %v5705_v13 }
 0x51a   :  { %4863 = vmatprep.subr.bf16.mxu0 %v5346_v0 }
 0x51c   :  { %4255 = vmatmul.mubr.f32.vlgmr.msra.gmra.mrb[4].mxu0 %v1285_v29 }
 0x51d   :  { %4865 = vmatpush3.bf16.msra.mxu0 %v4864_v42  ;;  %4269 = vmatprep.mubr.msk.f32.mxu0 %vm5347_vm0, %v5348_v1  ;;  %v2260_v42 = vand.u32 4294901760, %v2233_v41 }
 0x51e   :  { %4866 = vmatprep.subr.bf16.mxu0 %v5346_v0 }
 0x51f   :  { %v5815_v32 = vsub.f32 %v2233_v41, %v2260_v42 }
 0x521   :  { %4868 = vmatpush3.bf16.msra.mxu0 %v4867_v43  ;;  %v2263_v43 = vand.u32 4294901760, %v2234_v54 }
 0x522   :  { %4869 = vmatprep.subr.bf16.mxu0 %v5346_v0 }
 0x523   :  { %v5817_v37 = vsub.f32 %v2234_v54, %v2263_v43 }
 0x525   :  { %4871 = vmatpush3.bf16.msra.mxu0 %v4870_v46  ;;  %v5804_v46 = vpack.c.bf16 %v2263_v43, %v2260_v42 }
 0x526   :  { %4872 = vmatprep.subr.bf16.mxu0 %v5346_v0 }
 0x528   :  { %4270 = vmatmul.mubr.f32.vlgmr.msra.gmra.mrb[4].mxu0 %v1283_v21 }
 0x529   :  { %4874 = vmatpush3.bf16.msra.mxu0 %v5686_v45  ;;  %4284 = vmatprep.mubr.msk.f32.mxu0 %vm5347_vm0, %v5348_v1 }
 0x52a   :  { %4875 = vmatprep.subr.bf16.mxu0 %v5346_v0 }
 0x52d   :  { %4877 = vmatpush3.bf16.msra.mxu0 %v5699_v7  ;;  %v2180_v7 = vlaneseq }
 0x52e   :  { %4878 = vmatprep.subr.bf16.mxu0 %v5346_v0 }
 0x52f   :  { %v5781_v8 = vand.u32 127, %v2180_v7 }
 0x531   :  { %4880 = vmatpush3.bf16.msra.mxu0 %v5705_v13  ;;  %vm2182_vm6 = vcmp.lt.s32.totalorder %v5781_v8, 48  ;;  %vm2874_vm9 = vcmp.lt.s32.totalorder %v5781_v8, 90 }
 0x532   :  { %4287 = vmatprep.subr.mxu0 %v5348_v1  ;;  %v5785_v13 = vsel %vm2182_vm6, 1.0, %v5348_v1 }
 0x533   :  { %v5788_v10 = vsub.f32 1.0, %v5785_v13 }
 0x534   :  { %4285 = vmatmul.mubr.f32.vlgmr.msra.gmra.mrb[4].mxu0 %v1283_v21  ;;  %v2240_v21 = vld [vmem:[#allocation5 + $0xe0] sm:$0xff] }
 0x535   :  { %4289 = vmatprep.mubr.msk.f32.mxu0 %vm5347_vm0, %v5348_v1  ;;  %4288 = vmatpush3.msra.mxu0 %v1735_v38  ;;  %v2281_v29 = vand.u32 4294901760, %v2240_v21 }
 0x536   :  { %4292 = vmatprep.subr.mxu0 %v5348_v1 }
 0x537   :  { %v5832_v48 = vsub.f32 %v2240_v21, %v2281_v29 }
 0x539   :  { %v6362_v21 = vand.u32 4294901760, %v5832_v48 }
 0x607   :  { %v1719_v57 = vpop.f32.mrb[4].mxu0 }
 0x608   :  { %v5137_v62 = vadd.f32 %v3645_v55, %v1719_v57  ;;  %v4286_v63 = vpop.f32.mrb[5].mxu0  ;;  %v2241_v55 = vld [vmem:[#allocation5 + $0xe8] sm:$0xff]  ;;  %v2243_v57 = vld [vmem:[#allocation5 + $0xf8] sm:$0xff] }
 0x609   :  { %v5826_v63 = vsub.f32 %v2238_v4, %v2275_v12 }
 0x60a   :  { %v1732_v2 = vsel %vm1723_vm5, %v5137_v62, 0  ;;  %1724 = vst.msk [vmem:[#allocation9] sm:$0xff] %vm1723_vm5, %v5137_v62  ;;  %v5824_v62 = vsub.f32 %v2237_v3, %v2272_v11 }
 0x60b   :  { %v1800_v44 = vand.u32 4294901760, %v1732_v2  ;;  %v2386_v53 = vand.u32 4294901760, %v5826_v63 }
 0x60d   :  { %v1801_v45 = vsub.f32 %v1732_v2, %v1800_v44  ;;  %v5828_v2 = vpack.c.bf16 %v2281_v29, %v2278_v28  ;;  %v2387_v4 = vsub.f32 %v5826_v63, %v2386_v53 }
 0x60f   :  { %v1802_v49 = vand.u32 4294901760, %v1801_v45  ;;  %v2388_v12 = vand.u32 4294901760, %v2387_v4 }
 0x611   :  { %v1803_v60 = vsub.f32 %v1801_v45, %v1802_v49 }
 0x613   :  { %v1804_v6 = vand.u32 4294901760, %v1803_v60 }
 0x615   :  { %4290 = vmatmul.mubr.f32.vlgmr.msra.gmra.mrb[6].mxu0 %v1804_v6  ;;  %v2246_v6 = vld [vmem:[#allocation5 + $0x110] sm:$0xf] }
 0x616   :  { %4293 = vmatpush3.msra.mxu0 %v1815_v61  ;;  %4294 = vmatprep.mubr.msk.f32.mxu0 %vm5347_vm0, %v5348_v1  ;;  %v2290_v61 = vand.u32 4294901760, %v2243_v57 }
 0x617   :  { %4297 = vmatprep.subr.mxu0 %v5348_v1 }
 0x61d   :  { %4295 = vmatmul.mubr.f32.vlgmr.msra.gmra.mrb[6].mxu0 %v1800_v44 }
 0x61e   :  { %4298 = vmatpush3.msra.mxu0 %v1812_v56  ;;  %4299 = vmatprep.mubr.msk.f32.mxu0 %vm5347_vm0, %v5348_v1  ;;  %v2242_v56 = vld [vmem:[#allocation5 + $0xf0] sm:$0xff] }
 0x61f   :  { %4302 = vmatprep.subr.mxu0 %v5348_v1  ;;  %v2287_v60 = vand.u32 4294901760, %v2242_v56 }
 0x625   :  { %4300 = vmatmul.mubr.f32.vlgmr.msra.gmra.mrb[6].mxu0 %v1801_v45  ;;  %v2245_v45 = vld [vmem:[#allocation5 + $0x108] sm:$0xff] }
 0x626   :  { %4303 = vmatpush3.msra.mxu0 %v1735_v38  ;;  %4304 = vmatprep.mubr.msk.f32.mxu0 %vm5347_vm0, %v5348_v1 }
 0x627   :  { %4307 = vmatprep.subr.mxu0 %v5348_v1 }
 0x62d   :  { %4305 = vmatmul.mubr.f32.vlgmr.msra.gmra.mrb[6].mxu0 %v1802_v49  ;;  %v2284_v49 = vand.u32 4294901760, %v2241_v55 }
 0x62e   :  { %4308 = vmatpush3.msra.mxu0 %v1813_v5  ;;  %4309 = vmatprep.mubr.msk.f32.mxu0 %vm5347_vm0, %v5348_v1  ;;  %v5830_v5 = vsub.f32 %v2239_v15, %v2278_v28 }
 0x62f   :  { %4312 = vmatprep.subr.mxu0 %v5348_v1 }
 0x630   :  { %v6363_v15 = vand.u32 4294901760, %v5830_v5 }
 0x632   :  { %v2394_v29 = vsub.f32 %v5830_v5, %v6363_v15 }
 0x635   :  { %4310 = vmatmul.mubr.f32.vlgmr.msra.gmra.mrb[6].mxu0 %v1800_v44 }
 0x636   :  { %4313 = vmatpush3.msra.mxu0 %v1735_v38  ;;  %4314 = vmatprep.mubr.msk.f32.mxu0 %vm5347_vm0, %v5348_v1  ;;  %v5821_v38 = vsub.f32 %v2236_v52, %v2269_v58  ;;  %v2379_v52 = vand.u32 4294901760, %v5824_v62 }
 0x637   :  { %4881 = vmatprep.subr.bf16.mxu0 %v5346_v0 }
 0x638   :  { %v2380_v3 = vsub.f32 %v5824_v62, %v2379_v52 }
 0x63a   :  { %v2381_v11 = vand.u32 4294901760, %v2380_v3 }
 0x63c   :  { %v5890_v28 = vpack.c.bf16 %v2388_v12, %v2381_v11 }
 0x63d   :  { %4315 = vmatmul.mubr.f32.vlgmr.msra.gmra.mrb[6].mxu0 %v1800_v44  ;;  %v2244_v44 = vld [vmem:[#allocation5 + $0x100] sm:$0xff] }
 0x63e   :  { %4345 = vmatprep.mubr.msk.f32.mxu0 %vm5347_vm0, %v5348_v1  ;;  %4883 = vmatpush3.bf16.msra.mxu0 %v5804_v46  ;;  %v2293_v7 = vand.u32 4294901760, %v2244_v44 }
 0x63f   :  { %4884 = vmatprep.subr.bf16.mxu0 %v5346_v0 }
 0x642   :  { %4886 = vmatpush3.bf16.msra.mxu0 %v5808_v59 }
 0x643   :  { %4887 = vmatprep.subr.bf16.mxu0 %v5346_v0 }
 0x646   :  { %4889 = vmatpush3.bf16.msra.mxu0 %v5812_v14 }
 0x647   :  { %4890 = vmatprep.subr.bf16.mxu0 %v5346_v0 }
 0x64a   :  { %4892 = vmatpush3.bf16.msra.mxu0 %v5828_v2 }
 0x64b   :  { %4893 = vmatprep.subr.bf16.mxu0 %v5346_v0 }
 0x710   :  { %v2176_v16 = vpop.f32.mrb[6].mxu0 }
 0x711   :  { %v5138_v17 = vadd.f32 %v3646_v9, %v2176_v16  ;;  %v4316_v18 = vpop.f32.mrb[7].mxu0  ;;  %v2296_v9 = vand.u32 4294901760, %v2245_v45  ;;  %v5836_v16 = vpack.c.bf16 %v2287_v60, %v2284_v49 }
 0x712   :  { %v5840_v18 = vsub.f32 %v2242_v56, %v2287_v60  ;;  %v2395_v56 = vand.u32 4294901760, %v2394_v29  ;;  %v4924_v29 = vpack.c.bf16 %v5817_v37, %v5815_v32 }
 0x713   :  { %v2191_v19 = vmul.f32 %v5138_v17, %v5788_v10  ;;  %v2186_v22 = vmul.f32 %v5138_v17, %v5785_v13  ;;  %4895 = vmatpush3.bf16.msra.mxu0 %v5836_v16 }
 0x714   :  { %4896 = vmatprep.subr.bf16.mxu0 %v5346_v0 }
 0x715   :  { %v2192_v23 = vsel %vm2187_vm7, %v2191_v19, 0.0  ;;  %v2188_v24 = vsel %vm2187_vm7, %v2186_v22, 0.0  ;;  %v5842_v19 = vsub.f32 %v2243_v57, %v2290_v61  ;;  %v5844_v22 = vsub.f32 %v2244_v44, %v2293_v7 }
 0x716   :  { %2193 = vadd.xlane.f32.xlu1 %v2192_v23  ;;  %2189 = vadd.xlane.f32.xlu0 %v2188_v24  ;;  %v2257_v23 = vsel %vm2255_vm8, %v2246_v6, 0  ;;  %v5846_v24 = vsub.f32 %v2245_v45, %v2296_v9  ;;  %v6360_v45 = vand.u32 4294901760, %v5840_v18 }
 0x7a3   :  { %v2194_v25 = vpop.xlane.xlu1 %2193  ;;  %v2190_v26 = vpop.xlane.xlu0 %2189 }
 0x7a4   :  { %v2197_v27 = vmul.f32 0.016666668, %v2194_v25  ;;  %v2195_v30 = vmul.f32 0.020833334, %v2190_v26  ;;  %v2299_v25 = vand.u32 4294901760, %v2257_v23  ;;  %v5849_v26 = vpack.c.bf16 %v2293_v7, %v2290_v61 }
 0x7a5   :  { %v2415_v61 = vsub.f32 %v5840_v18, %v6360_v45  ;;  %v3649_v45 = vld [vmem:[#allocation7 + $0x9] ss:$0 sm:$0xff] }
 0x7a6   :  { %v2198_v31 = vmul.f32 %v2197_v27, %v5788_v10  ;;  %v2196_v33 = vmul.f32 %v5785_v13, %v2195_v30  ;;  %v5852_v27 = vsub.f32 %v2257_v23, %v2299_v25  ;;  %4898 = vmatpush3.bf16.msra.mxu0 %v5849_v26  ;;  %v5855_v30 = vpack.c.bf16 %v2299_v25, %v2296_v9 }
 0x7a7   :  { %4899 = vmatprep.subr.bf16.mxu0 %v5346_v0  ;;  %v2416_v7 = vand.u32 4294901760, %v2415_v61  ;;  %v6359_v9 = vand.u32 4294901760, %v5842_v19  ;;  %v6358_v23 = vand.u32 4294901760, %v5844_v22  ;;  %v4939_v61 = vpack.c.bf16 %v5844_v22, %v5842_v19 }
 0x7a8   :  { %v2199_v34 = vadd.f32 %v2198_v31, %v2196_v33  ;;  %v2351_v31 = vand.u32 4294901760, %v5815_v32  ;;  %v2358_v33 = vand.u32 4294901760, %v5817_v37 }
 0x7aa   :  { %v5796_v36 = vsub.f32 %v5138_v17, %v2199_v34  ;;  %v5838_v17 = vsub.f32 %v2241_v55, %v2284_v49  ;;  %v2352_v34 = vsub.f32 %v5815_v32, %v2351_v31  ;;  %4901 = vmatpush3.bf16.msra.mxu0 %v5855_v30  ;;  %v2401_v55 = vsub.f32 %v5832_v48, %v6362_v21 }
 0x7ab   :  { %4902 = vmatprep.subr.bf16.mxu0 %v5346_v0  ;;  %v6372_v32 = vand.u32 4294901760, %v5830_v5 }
 0x7ac   :  { %v2201_v39 = vmul.f32 %v5796_v36, %v5796_v36  ;;  %v2402_v57 = vand.u32 4294901760, %v2401_v55  ;;  %v6361_v44 = vand.u32 4294901760, %v5838_v17  ;;  %v4927_v55 = vpack.c.bf16 %v5821_v38, %v5819_v20 }
 0x7ae   :  { %v2207_v50 = vmul.f32 %v2201_v39, %v5788_v10  ;;  %v2202_v51 = vmul.f32 %v5785_v13, %v2201_v39  ;;  %v2359_v39 = vsub.f32 %v5817_v37, %v2358_v33  ;;  %v4912_v49 = vpack.c.bf16 %v2402_v57, %v2395_v56 }
 0x7af   :  { %v2408_v60 = vsub.f32 %v5838_v17, %v6361_v44  ;;  %v4930_v56 = vpack.c.bf16 %v5826_v63, %v5824_v62  ;;  %v4933_v57 = vpack.c.bf16 %v5832_v48, %v5830_v5  ;;  %v6373_v37 = vand.u32 4294901760, %v5832_v48 }
 0x7b0   :  { %v2208_v35 = vsel %vm2187_vm7, %v2207_v50, 0.0  ;;  %v2203_v40 = vsel %vm2187_vm7, %v2202_v51, 0.0  ;;  %v2353_v50 = vand.u32 4294901760, %v2352_v34  ;;  %v2360_v51 = vand.u32 4294901760, %v2359_v39 }
 0x7b1   :  { %2209 = vadd.xlane.f32.xlu1 %v2208_v35  ;;  %2204 = vadd.xlane.f32.xlu0 %v2203_v40  ;;  %v2365_v35 = vand.u32 4294901760, %v5819_v20  ;;  %v2372_v40 = vand.u32 4294901760, %v5821_v38  ;;  %v2409_v6 = vand.u32 4294901760, %v2408_v60  ;;  %v2422_v34 = vsub.f32 %v5842_v19, %v6359_v9 }
 0x7b2   :  { %v5870_v41 = vpack.c.bf16 %v2360_v51, %v2353_v50  ;;  %v2429_v39 = vsub.f32 %v5844_v22, %v6358_v23  ;;  %v4936_v60 = vpack.c.bf16 %v5840_v18, %v5838_v17  ;;  %v3648_v23 = vld [vmem:[#allocation7 + $0x8] ss:$0 sm:$0xff]  ;;  %v6376_v62 = vand.u32 4294901760, %v5842_v19 }
 0x7b3   :  { %v2366_v54 = vsub.f32 %v5819_v20, %v2365_v35  ;;  %v2373_v42 = vsub.f32 %v5821_v38, %v2372_v40  ;;  %v4915_v25 = vpack.c.bf16 %v2416_v7, %v2409_v6  ;;  %v2423_v50 = vand.u32 4294901760, %v2422_v34 }
 0x7b4   :  { %v2430_v51 = vand.u32 4294901760, %v2429_v39  ;;  %v4942_v6 = vpack.c.bf16 %v5852_v27, %v5846_v24  ;;  %v4975_v20 = vpack.c.bf16 %v6373_v37, %v6372_v32  ;;  %v6374_v38 = vand.u32 4294901760, %v5838_v17 }
 0x7b5   :  { %v2367_v43 = vand.u32 4294901760, %v2366_v54  ;;  %v2374_v47 = vand.u32 4294901760, %v2373_v42  ;;  %v6357_v54 = vand.u32 4294901760, %v5846_v24  ;;  %v6356_v42 = vand.u32 4294901760, %v5852_v27 }
 0x7b6   :  { %v6377_v63 = vand.u32 4294901760, %v5844_v22  ;;  %v6378_v5 = vand.u32 4294901760, %v5846_v24  ;;  %v6379_v48 = vand.u32 4294901760, %v5852_v27 }
 0x7b7   :  { %v5880_v58 = vpack.c.bf16 %v2374_v47, %v2367_v43  ;;  %v4918_v43 = vpack.c.bf16 %v2430_v51, %v2423_v50  ;;  %v2436_v47 = vsub.f32 %v5846_v24, %v6357_v54  ;;  %v2443_v3 = vsub.f32 %v5852_v27, %v6356_v42 }
 0x7b9   :  { %v2437_v4 = vand.u32 4294901760, %v2436_v47  ;;  %v2444_v11 = vand.u32 4294901760, %v2443_v3 }
 0x7bb   :  { %v4921_v12 = vpack.c.bf16 %v2444_v11, %v2437_v4 }
 0x83e   :  { %v2210_v7 = vpop.xlane.xlu1 %2209  ;;  %v2205_v34 = vpop.xlane.xlu0 %2204 }
 0x83f   :  { %v2211_v39 = vmul.f32 0.016666668, %v2210_v7  ;;  %v2206_v50 = vmul.f32 0.020833334, %v2205_v34 }
 0x841   :  { %v2215_v51 = vadd.f32 1e-05, %v2211_v39  ;;  %v2212_v47 = vadd.f32 1e-05, %v2206_v50 }
 0x843   :  { %5211 = vrsqrt.f32 %v2215_v51 }
 0x844   :  { %5213 = vrsqrt.f32 %v2212_v47 }
 0x84d   :  { %v5212_v3 = vpop.eup %5211 }
 0x84e   :  { %v5214_v4 = vpop.eup %5213  ;;  %v2217_v11 = vmul.f32 %v5212_v3, %v5788_v10  ;;  %v4969_v10 = vpack.c.bf16 %v2372_v40, %v2365_v35  ;;  %v4981_v35 = vpack.c.bf16 %v6377_v63, %v6376_v62  ;;  %v4984_v40 = vpack.c.bf16 %v6379_v48, %v6378_v5  ;;  %v2931_v3 = vld [vmem:[#allocation5 + $0x148] sm:$0xff]  ;;  %v2938_v62 = vld [vmem:[#allocation5 + $0x180] sm:$0xff] }
 0x84f   :  { %v2214_v42 = vmul.f32 %v5214_v4, %v5785_v13  ;;  %v4966_v13 = vpack.c.bf16 %v2358_v33, %v2351_v31  ;;  %v6375_v31 = vand.u32 4294901760, %v5840_v18  ;;  %v2932_v4 = vld [vmem:[#allocation5 + $0x150] sm:$0xff] }
 0x851   :  { %v2218_v54 = vadd.f32 %v2217_v11, %v2214_v42  ;;  %v4978_v33 = vpack.c.bf16 %v6375_v31, %v6374_v38  ;;  %v2927_v42 = vld [vmem:[#allocation5 + $0x128] sm:$0xff]  ;;  %v2967_v11 = vand.u32 4294901760, %v2931_v3  ;;  %v2936_v31 = vld [vmem:[#allocation5 + $0x170] sm:$0xff] }
 0x852   :  { %v2982_v48 = vand.u32 4294901760, %v2936_v31 }
 0x853   :  { %v2221_v9 = vmul.f32 %v2218_v54, %v5796_v36  ;;  %v4972_v36 = vpack.c.bf16 %v2386_v53, %v2379_v52 }
 0x855   :  { %v2226_v44 = vmul.f32 %v3648_v23, %v2221_v9  ;;  %v2926_v9 = vld [vmem:[#allocation5 + $0x120] sm:$0xff] }
 0x857   :  { %v2231_v21 = vadd.f32 %v3649_v45, %v2226_v44 }
 0x859   :  { %v2232_v15 = vmax.f32 %v2231_v21, 0.0 }
 0x85b   :  { %v2253_v7 = vsel %vm2187_vm7, %v2232_v15, 0 }
 0x85c   :  { %v5940_v34 = vand.u32 4294901760, %v2253_v7 }
 0x85e   :  { %v2339_v39 = vsub.f32 %v2253_v7, %v5940_v34  ;;  %v2970_v7 = vand.u32 4294901760, %v2932_v4 }
 0x860   :  { %v2340_v50 = vand.u32 4294901760, %v2339_v39  ;;  %v6085_v38 = vsub.f32 %v2932_v4, %v2970_v7 }
 0x862   :  { %v2341_v51 = vsub.f32 %v2339_v39, %v2340_v50  ;;  %v6370_v4 = vand.u32 4294901760, %v6085_v38 }
 0x864   :  { %v2342_v47 = vand.u32 4294901760, %v2341_v51 }
 0x866   :  { %4346 = vmatmul.mubr.f32.vlgmr.msra.gmra.mrb[8].mxu0 %v2342_v47 }
 0x867   :  { %4904 = vmatpush3.bf16.msra.mxu0 %v5870_v41  ;;  %4376 = vmatprep.mubr.msk.f32.mxu0 %vm5347_vm0, %v5348_v1 }
 0x868   :  { %4905 = vmatprep.subr.bf16.mxu0 %v5346_v0 }
 0x86b   :  { %4907 = vmatpush3.bf16.msra.mxu0 %v5880_v58 }
 0x86c   :  { %4908 = vmatprep.subr.bf16.mxu0 %v5346_v0 }
 0x86f   :  { %4910 = vmatpush3.bf16.msra.mxu0 %v5890_v28 }
 0x870   :  { %4911 = vmatprep.subr.bf16.mxu0 %v5346_v0 }
 0x873   :  { %4913 = vmatpush3.bf16.msra.mxu0 %v4912_v49  ;;  %v2925_v49 = vld [vmem:[#allocation5 + $0x118] sm:$0xff] }
 0x874   :  { %4914 = vmatprep.subr.bf16.mxu0 %v5346_v0  ;;  %v2949_v23 = vand.u32 4294901760, %v2925_v49 }
 0x877   :  { %4916 = vmatpush3.bf16.msra.mxu0 %v4915_v25  ;;  %v2952_v25 = vand.u32 4294901760, %v2926_v9 }
 0x878   :  { %4917 = vmatprep.subr.bf16.mxu0 %v5346_v0 }
 0x879   :  { %v6056_v54 = vpack.c.bf16 %v2952_v25, %v2949_v23 }
 0x87b   :  { %4919 = vmatpush3.bf16.msra.mxu0 %v4918_v43  ;;  %v2928_v43 = vld [vmem:[#allocation5 + $0x130] sm:$0xff]  ;;  %5009 = vmatpush3.bf16.msra.mxu1 %v6056_v54 }
 0x87c   :  { %4920 = vmatprep.subr.bf16.mxu0 %v5346_v0  ;;  %5010 = vmatprep.subr.bf16.mxu1 %v5346_v0 }
 0x87f   :  { %4922 = vmatpush3.bf16.msra.mxu0 %v4921_v12  ;;  %v2955_v12 = vand.u32 4294901760, %v2927_v42 }
 0x880   :  { %4923 = vmatprep.subr.bf16.mxu0 %v5346_v0 }
 0x881   :  { %v6074_v51 = vsub.f32 %v2927_v42, %v2955_v12 }
 0x882   :  { %4377 = vmatmul.mubr.f32.vlgmr.msra.gmra.mrb[8].mxu0 %v5940_v34 }
 0x883   :  { %4925 = vmatpush3.bf16.msra.mxu0 %v4924_v29  ;;  %4407 = vmatprep.mubr.msk.f32.mxu0 %vm5347_vm0, %v5348_v1  ;;  %v2958_v29 = vand.u32 4294901760, %v2928_v43 }
 0x884   :  { %4926 = vmatprep.subr.bf16.mxu0 %v5346_v0 }
 0x885   :  { %v6076_v47 = vsub.f32 %v2928_v43, %v2958_v29 }
 0x887   :  { %4928 = vmatpush3.bf16.msra.mxu0 %v4927_v55  ;;  %v6060_v55 = vpack.c.bf16 %v2958_v29, %v2955_v12 }
 0x888   :  { %4929 = vmatprep.subr.bf16.mxu0 %v5346_v0 }
 0x889   :  { %5012 = vmatpush3.bf16.msra.mxu1 %v6060_v55 }
 0x88a   :  { %5013 = vmatprep.subr.bf16.mxu1 %v5346_v0 }
 0x88b   :  { %4931 = vmatpush3.bf16.msra.mxu0 %v4930_v56  ;;  %v2929_v56 = vld [vmem:[#allocation5 + $0x138] sm:$0xff] }
 0x88c   :  { %4932 = vmatprep.subr.bf16.mxu0 %v5346_v0 }
 0x88f   :  { %4934 = vmatpush3.bf16.msra.mxu0 %v4933_v57  ;;  %v2930_v57 = vld [vmem:[#allocation5 + $0x140] sm:$0xff] }
 0x890   :  { %4935 = vmatprep.subr.bf16.mxu0 %v5346_v0 }
 0x893   :  { %4937 = vmatpush3.bf16.msra.mxu0 %v4936_v60  ;;  %v2961_v60 = vand.u32 4294901760, %v2929_v56 }
 0x894   :  { %4938 = vmatprep.subr.bf16.mxu0 %v5346_v0 }
 0x895   :  { %v6078_v32 = vsub.f32 %v2929_v56, %v2961_v60 }
 0x897   :  { %4940 = vmatpush3.bf16.msra.mxu0 %v4939_v61  ;;  %v2964_v61 = vand.u32 4294901760, %v2930_v57  ;;  %v3069_v43 = vand.u32 4294901760, %v6078_v32 }
 0x898   :  { %4941 = vmatprep.subr.bf16.mxu0 %v5346_v0 }
 0x899   :  { %v6080_v37 = vsub.f32 %v2930_v57, %v2964_v61  ;;  %v3070_v56 = vsub.f32 %v6078_v32, %v3069_v43 }
 0x89b   :  { %4943 = vmatpush3.bf16.msra.mxu0 %v4942_v6  ;;  %v6064_v6 = vpack.c.bf16 %v2964_v61, %v2961_v60  ;;  %v3076_v12 = vand.u32 4294901760, %v6080_v37  ;;  %v3071_v60 = vand.u32 4294901760, %v3070_v56 }
 0x89c   :  { %4944 = vmatprep.subr.bf16.mxu0 %v5346_v0 }
 0x89d   :  { %5015 = vmatpush3.bf16.msra.mxu1 %v6064_v6  ;;  %v3077_v57 = vsub.f32 %v6080_v37, %v3076_v12 }
 0x89e   :  { %4408 = vmatmul.mubr.f32.vlgmr.msra.gmra.mrb[8].mxu0 %v2339_v39  ;;  %5016 = vmatprep.subr.bf16.mxu1 %v5346_v0  ;;  %v6070_v39 = vsub.f32 %v2925_v49, %v2949_v23 }
 0x89f   :  { %4946 = vmatpush3.bf16.msra.mxu0 %v5804_v46  ;;  %4438 = vmatprep.mubr.msk.f32.mxu0 %vm5347_vm0, %v5348_v1  ;;  %v3078_v61 = vand.u32 4294901760, %v3077_v57 }
 0x8a0   :  { %4947 = vmatprep.subr.bf16.mxu0 %v5346_v0 }
 0x8a3   :  { %4949 = vmatpush3.bf16.msra.mxu0 %v5808_v59 }
 0x8a4   :  { %4950 = vmatprep.subr.bf16.mxu0 %v5346_v0 }
 0x8a7   :  { %4952 = vmatpush3.bf16.msra.mxu0 %v5812_v14 }
 0x8a8   :  { %4953 = vmatprep.subr.bf16.mxu0 %v5346_v0 }
 0x8ab   :  { %4955 = vmatpush3.bf16.msra.mxu0 %v5828_v2 }
 0x8ac   :  { %4956 = vmatprep.subr.bf16.mxu0 %v5346_v0 }
 0x8af   :  { %4958 = vmatpush3.bf16.msra.mxu0 %v5836_v16 }
 0x8b0   :  { %4959 = vmatprep.subr.bf16.mxu0 %v5346_v0 }
 0x8b3   :  { %4961 = vmatpush3.bf16.msra.mxu0 %v5849_v26 }
 0x8b4   :  { %4962 = vmatprep.subr.bf16.mxu0 %v5346_v0 }
 0x8b7   :  { %4964 = vmatpush3.bf16.msra.mxu0 %v5855_v30 }
 0x8b8   :  { %4965 = vmatprep.subr.bf16.mxu0 %v5346_v0 }
 0x8ba   :  { %4439 = vmatmul.mubr.f32.vlgmr.msra.gmra.mrb[8].mxu0 %v2340_v50  ;;  %v6072_v50 = vsub.f32 %v2926_v9, %v2952_v25 }
 0x8bb   :  { %4967 = vmatpush3.bf16.msra.mxu0 %v4966_v13  ;;  %4469 = vmatprep.mubr.msk.f32.mxu0 %vm5347_vm0, %v5348_v1  ;;  %v2933_v13 = vld [vmem:[#allocation5 + $0x158] sm:$0xff] }
 0x8bc   :  { %4968 = vmatprep.subr.bf16.mxu0 %v5346_v0  ;;  %v2973_v63 = vand.u32 4294901760, %v2933_v13 }
 0x8bf   :  { %4970 = vmatpush3.bf16.msra.mxu0 %v4969_v10  ;;  %v2934_v10 = vld [vmem:[#allocation5 + $0x160] sm:$0xff] }
 0x8c0   :  { %4971 = vmatprep.subr.bf16.mxu0 %v5346_v0 }
 0x8c3   :  { %4973 = vmatpush3.bf16.msra.mxu0 %v4972_v36  ;;  %v2935_v36 = vld [vmem:[#allocation5 + $0x168] sm:$0xff] }
 0x8c4   :  { %4974 = vmatprep.subr.bf16.mxu0 %v5346_v0  ;;  %v2979_v5 = vand.u32 4294901760, %v2935_v36 }
 0x8c7   :  { %4976 = vmatpush3.bf16.msra.mxu0 %v4975_v20  ;;  %v6083_v20 = vsub.f32 %v2931_v3, %v2967_v11 }
 0x8c8   :  { %4977 = vmatprep.subr.bf16.mxu0 %v5346_v0 }
 0x8c9   :  { %v6371_v3 = vand.u32 4294901760, %v6083_v20 }
 0x8cb   :  { %4979 = vmatpush3.bf16.msra.mxu0 %v4978_v33  ;;  %v2937_v33 = vld [vmem:[#allocation5 + $0x178] sm:$0xff] }
 0x8cc   :  { %4980 = vmatprep.subr.bf16.mxu0 %v5346_v0 }
 0x8cf   :  { %4982 = vmatpush3.bf16.msra.mxu0 %v4981_v35  ;;  %v2976_v35 = vand.u32 4294901760, %v2934_v10 }
 0x8d0   :  { %4983 = vmatprep.subr.bf16.mxu0 %v5346_v0 }
 0x8d3   :  { %4985 = vmatpush3.bf16.msra.mxu0 %v4984_v40  ;;  %v2985_v40 = vand.u32 4294901760, %v2937_v33 }
 0x8d4   :  { %4986 = vmatprep.subr.bf16.mxu0 %v5346_v0 }
 0x8d6   :  { %4470 = vmatmul.mubr.f32.vlgmr.msra.gmra.mrb[8].mxu0 %v5940_v34 }
 0x8d7   :  { %4988 = vmatpush3.bf16.msra.mxu0 %v5804_v46  ;;  %4500 = vmatprep.mubr.msk.f32.mxu0 %vm5347_vm0, %v5348_v1  ;;  %v6037_v46 = vsel %vm2874_vm9, 1.0, %v5348_v1 }
 0x8d8   :  { %4989 = vmatprep.subr.bf16.mxu0 %v5346_v0 }
 0x8db   :  { %4991 = vmatpush3.bf16.msra.mxu0 %v5808_v59  ;;  %v3650_v59 = vld [vmem:[#allocation7 + $0xa] ss:$0 sm:$0xff] }
 0x8dc   :  { %4992 = vmatprep.subr.bf16.mxu0 %v5346_v0 }
 0x8df   :  { %4994 = vmatpush3.bf16.msra.mxu0 %v5812_v14  ;;  %v6040_v14 = vsub.f32 1.0, %v6037_v46 }
 0x8e0   :  { %4995 = vmatprep.subr.bf16.mxu0 %v5346_v0 }
 0x8e3   :  { %4997 = vmatpush3.bf16.msra.mxu0 %v5828_v2 }
 0x8e4   :  { %4998 = vmatprep.subr.bf16.mxu0 %v5346_v0 }
 0x8e7   :  { %5000 = vmatpush3.bf16.msra.mxu0 %v5836_v16 }
 0x8e8   :  { %5001 = vmatprep.subr.bf16.mxu0 %v5346_v0 }
 0x8eb   :  { %5003 = vmatpush3.bf16.msra.mxu0 %v5849_v26 }
 0x8ec   :  { %5004 = vmatprep.subr.bf16.mxu0 %v5346_v0 }
 0x8ef   :  { %5006 = vmatpush3.bf16.msra.mxu0 %v5855_v30 }
 0x8f2   :  { %4501 = vmatmul.mubr.f32.vlgmr.msra.gmra.mrb[8].mxu0 %v5940_v34  ;;  %v6068_v34 = vpack.c.bf16 %v2970_v7, %v2967_v11  ;;  %v6149_v11 = vpack.c.bf16 %v3078_v61, %v3071_v60  ;;  %v3084_v7 = vsub.f32 %v6083_v20, %v6371_v3 }
 0x8f4   :  { %5018 = vmatpush3.bf16.msra.mxu1 %v6068_v34 }
 0x8f5   :  { %5019 = vmatprep.subr.bf16.mxu1 %v5346_v0 }
 0x9c5   :  { %v2870_v2 = vpop.f32.mrb[8].mxu0 }
 0x9c6   :  { %v5139_v16 = vadd.f32 %v3650_v59, %v2870_v2  ;;  %v4502_v17 = vpop.f32.mrb[9].mxu0  ;;  %v6088_v59 = vpack.c.bf16 %v2976_v35, %v2973_v63  ;;  %v6090_v2 = vsub.f32 %v2933_v13, %v2973_v63  ;;  %v3091_v13 = vsub.f32 %v6085_v38, %v6370_v4 }
 0x9c7   :  { %v2988_v17 = vand.u32 4294901760, %v2938_v62 }
 0x9c8   :  { %v2883_v18 = vmul.f32 %v5139_v16, %v6040_v14  ;;  %v2878_v19 = vmul.f32 %v5139_v16, %v6037_v46  ;;  %5021 = vmatpush3.bf16.msra.mxu1 %v6088_v59 }
 0x9c9   :  { %5022 = vmatprep.subr.bf16.mxu1 %v5346_v0 }
 0x9ca   :  { %v2884_v22 = vsel %vm2879_vm10, %v2883_v18, 0.0  ;;  %v2880_v24 = vsel %vm2879_vm10, %v2878_v19, 0.0  ;;  %v6094_v18 = vsub.f32 %v2935_v36, %v2979_v5  ;;  %v6096_v19 = vsub.f32 %v2936_v31, %v2982_v48 }
 0x9cb   :  { %2885 = vadd.xlane.f32.xlu1 %v2884_v22  ;;  %2881 = vadd.xlane.f32.xlu0 %v2880_v24  ;;  %v6098_v22 = vsub.f32 %v2937_v33, %v2985_v40  ;;  %v6101_v24 = vpack.c.bf16 %v2982_v48, %v2979_v5  ;;  %v3092_v36 = vand.u32 4294901760, %v3091_v13  ;;  %v6369_v31 = vand.u32 4294901760, %v6090_v2 }
 0x9cc   :  { %v5050_v13 = vpack.c.bf16 %v6072_v50, %v6070_v39 }
 0x9cd   :  { %5024 = vmatpush3.bf16.msra.mxu1 %v6101_v24  ;;  %v3098_v63 = vsub.f32 %v6090_v2, %v6369_v31  ;;  %v3653_v31 = vld [vmem:[#allocation7 + $0xc] ss:$0 sm:$0xff] }
 0x9ce   :  { %5025 = vmatprep.subr.bf16.mxu1 %v5346_v0 }
 0x9cf   :  { %v3099_v5 = vand.u32 4294901760, %v3098_v63  ;;  %v5059_v63 = vpack.c.bf16 %v6085_v38, %v6083_v20 }
 0xa58   :  { %v2886_v8 = vpop.xlane.xlu1 %2885  ;;  %v2882_v26 = vpop.xlane.xlu0 %2881 }
 0xa59   :  { %v2889_v27 = vmul.f32 0.033333335, %v2886_v8  ;;  %v2887_v30 = vmul.f32 0.011111111, %v2882_v26  ;;  %v6103_v8 = vsub.f32 %v2938_v62, %v2988_v17  ;;  %v6107_v26 = vpack.c.bf16 %v2988_v17, %v2985_v40 }
 0xa5a   :  { %v6367_v40 = vand.u32 4294901760, %v6094_v18  ;;  %v6366_v17 = vand.u32 4294901760, %v6096_v19 }
 0xa5b   :  { %v2890_v41 = vmul.f32 %v2889_v27, %v6040_v14  ;;  %v2888_v52 = vmul.f32 %v6037_v46, %v2887_v30  ;;  %v6110_v27 = vld [vmem:[#allocation5 + $0x188] sm:$0xff]  ;;  %v3041_v30 = vand.u32 4294901760, %v6070_v39  ;;  %5027 = vmatpush3.bf16.msra.mxu1 %v6107_v26 }
 0xa5c   :  { %4531 = vmatprep.subr.mxu1 %v5348_v1 }
 0xa5d   :  { %v2891_v53 = vadd.f32 %v2890_v41, %v2888_v52  ;;  %v3048_v41 = vand.u32 4294901760, %v6072_v50  ;;  %v3042_v52 = vsub.f32 %v6070_v39, %v3041_v30  ;;  %v5098_v39 = vpack.c.bf16 %v3076_v12, %v3069_v43 }
 0xa5f   :  { %v6048_v58 = vsub.f32 %v5139_v16, %v2891_v53  ;;  %v6092_v16 = vsub.f32 %v2934_v10, %v2976_v35  ;;  %v3049_v53 = vsub.f32 %v6072_v50, %v3048_v41  ;;  %v3085_v10 = vand.u32 4294901760, %v3084_v7 }
 0xa60   :  { %v6380_v50 = vand.u32 4294901760, %v6083_v20  ;;  %v6386_v20 = vand.u32 4294901760, %v6098_v22 }
 0xa61   :  { %v2893_v15 = vmul.f32 %v6048_v58, %v6048_v58  ;;  %v6368_v33 = vand.u32 4294901760, %v6092_v16  ;;  %v5038_v62 = vpack.c.bf16 %v3092_v36, %v3085_v10  ;;  %v5053_v10 = vpack.c.bf16 %v6076_v47, %v6074_v51 }
 0xa62   :  { %v5056_v36 = vpack.c.bf16 %v6080_v37, %v6078_v32  ;;  %v6384_v32 = vand.u32 4294901760, %v6094_v18  ;;  %v6385_v37 = vand.u32 4294901760, %v6096_v19 }
 0xa63   :  { %v2899_v21 = vmul.f32 %v2893_v15, %v6040_v14  ;;  %v2894_v28 = vmul.f32 %v6037_v46, %v2893_v15  ;;  %v6122_v15 = vand.u32 4294901760, %v6110_v27  ;;  %v3105_v35 = vsub.f32 %v6092_v16, %v6368_v33 }
 0xa65   :  { %v2900_v44 = vsel %vm2879_vm10, %v2899_v21, 0.0  ;;  %v2895_v45 = vsel %vm2879_vm10, %v2894_v28, 0.0  ;;  %v3043_v21 = vand.u32 4294901760, %v3042_v52  ;;  %v3050_v28 = vand.u32 4294901760, %v3049_v53  ;;  %4532 = vmatpush3.msra.mxu1 %v6122_v15 }
 0xa66   :  { %2901 = vadd.xlane.f32.xlu1 %v2900_v44  ;;  %2896 = vadd.xlane.f32.xlu0 %v2895_v45  ;;  %v3055_v44 = vand.u32 4294901760, %v6074_v51  ;;  %v3062_v45 = vand.u32 4294901760, %v6076_v47  ;;  %v3106_v48 = vand.u32 4294901760, %v3105_v35  ;;  %v3112_v53 = vsub.f32 %v6094_v18, %v6367_v40  ;;  %v3652_v40 = vld [vmem:[#allocation7 + $0xb] ss:$0 sm:$0xff] }
 0xa67   :  { %v6127_v49 = vpack.c.bf16 %v3050_v28, %v3043_v21  ;;  %5028 = vmatprep.subr.bf16.mxu1 %v5346_v0  ;;  %v3119_v21 = vsub.f32 %v6096_v19, %v6366_v17  ;;  %v5062_v35 = vpack.c.bf16 %v6092_v16, %v6090_v2 }
 0xa68   :  { %v3056_v9 = vsub.f32 %v6074_v51, %v3055_v44  ;;  %v3063_v23 = vsub.f32 %v6076_v47, %v3062_v45  ;;  %v5041_v52 = vpack.c.bf16 %v3106_v48, %v3099_v5  ;;  %v3113_v28 = vand.u32 4294901760, %v3112_v53 }
 0xa69   :  { %v5065_v5 = vpack.c.bf16 %v6096_v19, %v6094_v18  ;;  %v5068_v48 = vpack.c.bf16 %v6103_v8, %v6098_v22  ;;  %v6381_v51 = vand.u32 4294901760, %v6085_v38  ;;  %v6387_v38 = vand.u32 4294901760, %v6103_v8  ;;  %v3656_v19 = vld [vmem:[#allocation7 + $0xf] ss:$0 sm:$0xff] }
 0xa6a   :  { %v3057_v25 = vand.u32 4294901760, %v3056_v9  ;;  %v3064_v42 = vand.u32 4294901760, %v3063_v23  ;;  %v3120_v9 = vand.u32 4294901760, %v3119_v21  ;;  %v6365_v23 = vand.u32 4294901760, %v6098_v22 }
 0xa6b   :  { %v5101_v47 = vpack.c.bf16 %v6381_v51, %v6380_v50  ;;  %v5110_v43 = vpack.c.bf16 %v6387_v38, %v6386_v20 }
 0xa6c   :  { %v6139_v29 = vpack.c.bf16 %v3064_v42, %v3057_v25  ;;  %v6364_v25 = vand.u32 4294901760, %v6103_v8  ;;  %v5044_v42 = vpack.c.bf16 %v3120_v9, %v3113_v28  ;;  %v3126_v56 = vsub.f32 %v6098_v22, %v6365_v23 }
 0xa6e   :  { %v3133_v57 = vsub.f32 %v6103_v8, %v6364_v25  ;;  %v3127_v60 = vand.u32 4294901760, %v3126_v56 }
 0xa70   :  { %v3134_v61 = vand.u32 4294901760, %v3133_v57 }
 0xa72   :  { %v5047_v7 = vpack.c.bf16 %v3134_v61, %v3127_v60 }
 0xaf3   :  { %v2902_v53 = vpop.xlane.xlu1 %2901  ;;  %v2897_v21 = vpop.xlane.xlu0 %2896 }
 0xaf4   :  { %v2903_v28 = vmul.f32 0.033333335, %v2902_v53  ;;  %v2898_v9 = vmul.f32 0.011111111, %v2897_v21 }
 0xaf6   :  { %v2907_v56 = vadd.f32 1e-05, %v2903_v28  ;;  %v2904_v57 = vadd.f32 1e-05, %v2898_v9 }
 0xaf8   :  { %5215 = vrsqrt.f32 %v2907_v56 }
 0xaf9   :  { %5217 = vrsqrt.f32 %v2904_v57 }
 0xb02   :  { %v5216_v60 = vpop.eup %5215 }
 0xb03   :  { %v5218_v61 = vpop.eup %5217  ;;  %v2909_v25 = vmul.f32 %v5216_v60, %v6040_v14 }
 0xb04   :  { %v2906_v23 = vmul.f32 %v5218_v61, %v6037_v46 }
 0xb06   :  { %v2910_v17 = vadd.f32 %v2909_v25, %v2906_v23 }
 0xb08   :  { %v2913_v33 = vmul.f32 %v2910_v17, %v6048_v58  ;;  %v6217_v58 = vsub.f32 %v6110_v27, %v6122_v15  ;;  %v5092_v27 = vpack.c.bf16 %v3048_v41, %v3041_v30  ;;  %v6382_v30 = vand.u32 4294901760, %v6090_v2 }
 0xb09   :  { %v6383_v41 = vand.u32 4294901760, %v6092_v16 }
 0xb0a   :  { %v2918_v4 = vmul.f32 %v3652_v40, %v2913_v33 }
 0xb0c   :  { %v6198_v3 = vadd.f32 %v3653_v31, %v2918_v4 }
 0xb0e   :  { %v2924_v53 = vmax.f32 %v6198_v3, 0.0 }
 0xb10   :  { %v2946_v21 = vsel %vm2879_vm10, %v2924_v53, 0 }
 0xb11   :  { %v6204_v28 = vand.u32 4294901760, %v2946_v21 }
 0xb13   :  { %v3029_v14 = vsub.f32 %v2946_v21, %v6204_v28 }
 0xb15   :  { %v3030_v9 = vand.u32 4294901760, %v3029_v14 }
 0xb17   :  { %v3031_v46 = vsub.f32 %v3029_v14, %v3030_v9 }
 0xb19   :  { %v3032_v23 = vand.u32 4294901760, %v3031_v46 }
 0xb1b   :  { %4534 = vmatmul.mubr.f32.vlgmr.msra.gmra.mrb[4].mxu1 %v3032_v23 }
 0xb1c   :  { %5030 = vmatpush3.bf16.msra.mxu1 %v6127_v49  ;;  %4566 = vmatprep.mubr.msk.f32.mxu1 %vm5347_vm0, %v5348_v1  ;;  %v3139_v49 = vand.u32 4294901760, %v6217_v58 }
 0xb1d   :  { %5031 = vmatprep.subr.bf16.mxu1 %v5346_v0 }
 0xb20   :  { %5033 = vmatpush3.bf16.msra.mxu1 %v6139_v29  ;;  %v3140_v29 = vsub.f32 %v6217_v58, %v3139_v49 }
 0xb21   :  { %5034 = vmatprep.subr.bf16.mxu1 %v5346_v0 }
 0xb22   :  { %v3141_v4 = vand.u32 4294901760, %v3140_v29 }
 0xb24   :  { %5036 = vmatpush3.bf16.msra.mxu1 %v6149_v11  ;;  %v5095_v11 = vpack.c.bf16 %v3062_v45, %v3055_v44  ;;  %v5104_v44 = vpack.c.bf16 %v6383_v41, %v6382_v30  ;;  %v5107_v45 = vpack.c.bf16 %v6385_v37, %v6384_v32 }
 0xb25   :  { %5037 = vmatprep.subr.bf16.mxu1 %v5346_v0 }
 0xb28   :  { %5039 = vmatpush3.bf16.msra.mxu1 %v5038_v62 }
 0xb29   :  { %5040 = vmatprep.subr.bf16.mxu1 %v5346_v0 }
 0xb2c   :  { %5042 = vmatpush3.bf16.msra.mxu1 %v5041_v52 }
 0xb2d   :  { %5043 = vmatprep.subr.bf16.mxu1 %v5346_v0 }
 0xb30   :  { %5045 = vmatpush3.bf16.msra.mxu1 %v5044_v42 }
 0xb31   :  { %5046 = vmatprep.subr.bf16.mxu1 %v5346_v0 }
 0xb34   :  { %5048 = vmatpush3.bf16.msra.mxu1 %v5047_v7 }
 0xb35   :  { %4564 = vmatprep.subr.mxu1 %v5348_v1 }
 0xb38   :  { %4565 = vmatpush3.msra.mxu1 %v3141_v4 }
 0xb39   :  { %4567 = vmatmul.mubr.f32.vlgmr.msra.gmra.mrb[4].mxu1 %v6204_v28  ;;  %5049 = vmatprep.subr.bf16.mxu1 %v5346_v0 }
 0xb3a   :  { %5051 = vmatpush3.bf16.msra.mxu1 %v5050_v13  ;;  %4599 = vmatprep.mubr.msk.f32.mxu1 %vm5347_vm0, %v5348_v1 }
 0xb3b   :  { %5052 = vmatprep.subr.bf16.mxu1 %v5346_v0 }
 0xb3e   :  { %5054 = vmatpush3.bf16.msra.mxu1 %v5053_v10 }
 0xb3f   :  { %5055 = vmatprep.subr.bf16.mxu1 %v5346_v0 }
 0xb42   :  { %5057 = vmatpush3.bf16.msra.mxu1 %v5056_v36 }
 0xb43   :  { %5058 = vmatprep.subr.bf16.mxu1 %v5346_v0 }
 0xb46   :  { %5060 = vmatpush3.bf16.msra.mxu1 %v5059_v63 }
 0xb47   :  { %5061 = vmatprep.subr.bf16.mxu1 %v5346_v0 }
 0xb4a   :  { %5063 = vmatpush3.bf16.msra.mxu1 %v5062_v35 }
 0xb4b   :  { %5064 = vmatprep.subr.bf16.mxu1 %v5346_v0 }
 0xb4e   :  { %5066 = vmatpush3.bf16.msra.mxu1 %v5065_v5 }
 0xb4f   :  { %5067 = vmatprep.subr.bf16.mxu1 %v5346_v0 }
 0xb52   :  { %5069 = vmatpush3.bf16.msra.mxu1 %v5068_v48 }
 0xb53   :  { %4597 = vmatprep.subr.mxu1 %v5348_v1 }
 0xb56   :  { %4598 = vmatpush3.msra.mxu1 %v6217_v58 }
 0xb57   :  { %4600 = vmatmul.mubr.f32.vlgmr.msra.gmra.mrb[4].mxu1 %v3029_v14  ;;  %5070 = vmatprep.subr.bf16.mxu1 %v5346_v0 }
 0xb58   :  { %5072 = vmatpush3.bf16.msra.mxu1 %v6056_v54  ;;  %4632 = vmatprep.mubr.msk.f32.mxu1 %vm5347_vm0, %v5348_v1 }
 0xb59   :  { %5073 = vmatprep.subr.bf16.mxu1 %v5346_v0 }
 0xb5c   :  { %5075 = vmatpush3.bf16.msra.mxu1 %v6060_v55 }
 0xb5d   :  { %5076 = vmatprep.subr.bf16.mxu1 %v5346_v0 }
 0xb60   :  { %5078 = vmatpush3.bf16.msra.mxu1 %v6064_v6 }
 0xb61   :  { %5079 = vmatprep.subr.bf16.mxu1 %v5346_v0 }
 0xb64   :  { %5081 = vmatpush3.bf16.msra.mxu1 %v6068_v34 }
 0xb65   :  { %5082 = vmatprep.subr.bf16.mxu1 %v5346_v0 }
 0xb68   :  { %5084 = vmatpush3.bf16.msra.mxu1 %v6088_v59 }
 0xb69   :  { %5085 = vmatprep.subr.bf16.mxu1 %v5346_v0 }
 0xb6c   :  { %5087 = vmatpush3.bf16.msra.mxu1 %v6101_v24 }
 0xb6d   :  { %5088 = vmatprep.subr.bf16.mxu1 %v5346_v0 }
 0xb70   :  { %5090 = vmatpush3.bf16.msra.mxu1 %v6107_v26 }
 0xb71   :  { %4630 = vmatprep.subr.mxu1 %v5348_v1 }
 0xb74   :  { %4631 = vmatpush3.msra.mxu1 %v6122_v15 }
 0xb75   :  { %4633 = vmatmul.mubr.f32.vlgmr.msra.gmra.mrb[4].mxu1 %v3030_v9  ;;  %5091 = vmatprep.subr.bf16.mxu1 %v5346_v0 }
 0xb76   :  { %5093 = vmatpush3.bf16.msra.mxu1 %v5092_v27  ;;  %4665 = vmatprep.mubr.msk.f32.mxu1 %vm5347_vm0, %v5348_v1 }
 0xb77   :  { %5094 = vmatprep.subr.bf16.mxu1 %v5346_v0 }
 0xb7a   :  { %5096 = vmatpush3.bf16.msra.mxu1 %v5095_v11 }
 0xb7b   :  { %5097 = vmatprep.subr.bf16.mxu1 %v5346_v0 }
 0xb7e   :  { %5099 = vmatpush3.bf16.msra.mxu1 %v5098_v39 }
 0xb7f   :  { %5100 = vmatprep.subr.bf16.mxu1 %v5346_v0 }
 0xb82   :  { %5102 = vmatpush3.bf16.msra.mxu1 %v5101_v47 }
 0xb83   :  { %5103 = vmatprep.subr.bf16.mxu1 %v5346_v0 }
 0xb86   :  { %5105 = vmatpush3.bf16.msra.mxu1 %v5104_v44 }
 0xb87   :  { %5106 = vmatprep.subr.bf16.mxu1 %v5346_v0 }
 0xb8a   :  { %5108 = vmatpush3.bf16.msra.mxu1 %v5107_v45 }
 0xb8b   :  { %5109 = vmatprep.subr.bf16.mxu1 %v5346_v0 }
 0xb8e   :  { %5111 = vmatpush3.bf16.msra.mxu1 %v5110_v43 }
 0xb8f   :  { %4663 = vmatprep.subr.mxu1 %v5348_v1 }
 0xb92   :  { %4664 = vmatpush3.msra.mxu1 %v3139_v49 }
 0xb93   :  { %4666 = vmatmul.mubr.f32.vlgmr.msra.gmra.mrb[4].mxu1 %v6204_v28  ;;  %5112 = vmatprep.subr.bf16.mxu1 %v5346_v0 }
 0xb94   :  { %5114 = vmatpush3.bf16.msra.mxu1 %v6056_v54  ;;  %4698 = vmatprep.mubr.msk.f32.mxu1 %vm5347_vm0, %v5348_v1  ;;  %v3654_v54 = vld [vmem:[#allocation7 + $0xd] ss:$0 sm:$0xff] }
 0xb95   :  { %5115 = vmatprep.subr.bf16.mxu1 %v5346_v0 }
 0xb98   :  { %5117 = vmatpush3.bf16.msra.mxu1 %v6060_v55 }
 0xb99   :  { %5118 = vmatprep.subr.bf16.mxu1 %v5346_v0 }
 0xb9c   :  { %5120 = vmatpush3.bf16.msra.mxu1 %v6064_v6  ;;  %v3655_v6 = vld [vmem:[#allocation7 + $0xe] ss:$0 sm:$0xff] }
 0xb9d   :  { %5121 = vmatprep.subr.bf16.mxu1 %v5346_v0  ;;  %v3594_v16 = vmul.f32 %v3655_v6, %v2924_v53 }
 0xba0   :  { %5123 = vmatpush3.bf16.msra.mxu1 %v6068_v34 }
 0xba1   :  { %5124 = vmatprep.subr.bf16.mxu1 %v5346_v0 }
 0xba4   :  { %5126 = vmatpush3.bf16.msra.mxu1 %v6088_v59 }
 0xba5   :  { %5127 = vmatprep.subr.bf16.mxu1 %v5346_v0 }
 0xba8   :  { %5129 = vmatpush3.bf16.msra.mxu1 %v6101_v24 }
 0xba9   :  { %5130 = vmatprep.subr.bf16.mxu1 %v5346_v0  ;;  %v3595_v0 = vsel %vm2879_vm10, %v3594_v16, 0.0 }
 0xbac   :  { %5132 = vmatpush3.bf16.msra.mxu1 %v6107_v26 }
 0xbad   :  { %4696 = vmatprep.subr.mxu1 %v5348_v1 }
 0xbb0   :  { %4697 = vmatpush3.msra.mxu1 %v6122_v15 }
 0xbb1   :  { %4699 = vmatmul.mubr.f32.vlgmr.msra.gmra.mrb[4].mxu1 %v6204_v28 }
 0xc84   :  { %v3572_v55 = vpop.f32.mrb[4].mxu1 }
 0xc85   :  { %v5140_v34 = vadd.f32 %v3654_v54, %v3572_v55  ;;  %v4700_v2 = vpop.f32.mrb[5].mxu1 }
 0xc87   :  { %v3576_v59 = vsel %vm66_vm1, %v5140_v34, -inf }
 0xc88   :  { %3577 = vmax.xlane.f32.xlu0 %v3576_v59 }
 0xc8c   :  { %3596 = vadd.xlane.f32.xlu0 %v3595_v0 }
 0xd15   :  { %v3578_v18 = vpop.xlane.xlu0 %3577 }
 0xd16   :  { %v3579_v1 = vsub.f32 %v5140_v34, %v3578_v18 }
 0xd18   :  { %v3580_v22 = vmul.f32 1.442695, %v3579_v1 }
 0xd19   :  { %v3597_v24 = vpop.xlane.xlu0 %3596 }
 0xd1a   :  { %5219 = vpow2.f32 %v3580_v22  ;;  %v3602_v8 = vadd.f32 %v3656_v19, %v3597_v24 }
 0xd1c   :  { %3604 = vst.msk [vmem:[%s6355_s5] sm:$0xff] %vm3603_vm11, %v3602_v8 }
 0xd24   :  { %v5220_v26 = vpop.eup %5219 }
 0xd25   :  { %v3582_v15 = vsel %vm66_vm1, %v5220_v26, 0.0 }
 0xd26   :  { %3583 = vadd.xlane.f32.xlu1 %v3582_v15 }
 0xd27   :  { %5300 = shalt.err (!%p5297_p0)
}
 0xd28   :  { %s5301_s10 = scalar_lea.hbm %s6354_s4, 128 }
 0xd29   :  { %p5302_p1 = scmp.ne.s32.totalorder %s6354_s4, %s5301_s10  ;;  %p5305_p2 = scmp.lt.u32.totalorder %s5301_s10, %s6354_s4 }
 0xd2b   :  { %p5307_p3 = pnand %p5305_p2, %p5302_p1 }
 0xd2d   :  { %5310 = shalt.err (!%p5307_p3)
}
 0xd2e   :  { %3624 = dma.vmem_to_hbm [thread:$0]  %s3622_s6, 128, %s6354_s4, [#allocation10]  }
 0xd2f   :  { %s5350_s16 = smov [#allocation8]  }
 0xd30   :  { %s3611_s17 = sshll.u32 %s5350_s16, 4  ;;  %s3612_s17 = int_to_ptr.vmem [resolvable:$true] %s3611_s17 }
 0xd31   :  { %s5311_s1 = scalar_lea.vmem %s3612_s17, 128  ;;  %p5316_p5 = scmp.lt.s32.totalorder %s3612_s17, %s3612_s17 }
 0xd32   :  { %p5312_p4 = scmp.ne.s32.totalorder %s3612_s17, %s5311_s1  ;;  %p5317_p6 = scmp.lt.s32.totalorder %s5311_s1, %s5311_s1 }
 0xd34   :  { %p5318_p7 = por %p5317_p6, %p5316_p5 }
 0xd36   :  { %p5319_p8 = pnand %p5318_p7, %p5312_p4 }
 0xdb3   :  { %v3584_v12 = vpop.xlane.xlu1 %3583 }
 0xdb4   :  { %5221 = vrcp.f32 %v3584_v12 }
 0xdbe   :  { %v5222_v3 = vpop.eup %5221 }
 0xdbf   :  { %v3586_v31 = vmul.f32 %v5222_v3, %v5220_v26 }
 0xdc1   :  { %3587 = vst.msk [vmem:[#allocation8] sm:$0xff] %vm66_vm1, %v3586_v31 }
 0xdc2   :  { %5322 = shalt.err (!%p5319_p8)
}
 0xdc3   :  { %s5323_s4 = scalar_lea.hbm %s6353_s3, 128 }
 0xdc4   :  { %p5324_p9 = scmp.ne.s32.totalorder %s6353_s3, %s5323_s4  ;;  %p5327_p10 = scmp.lt.u32.totalorder %s5323_s4, %s6353_s3 }
 0xdc6   :  { %p5329_p11 = pnand %p5327_p10, %p5324_p9 }
 0xdc8   :  { %5332 = shalt.err (!%p5329_p11)
}
 0xdc9   :  { %3614 = dma.vmem_to_hbm [thread:$0]  %s3612_s17, 128, %s6353_s3, [#allocation4]  }
 0xdca   :  { %5337 = dma.done.wait [#allocation4], 128  }
 0xdcb   :  { %5338 = vsyncadd [#allocation4], 4294967168 }
 0xdcc   :  { %5339 = dma.done.wait [#allocation10], 128  }
 0xdcd   :  { %5340 = vsyncadd [#allocation10], 4294967168 }
 0xdce   :  { %3635 = vsyncpa [#allocation3], 1 }
 0xdcf   :  { %3636 = vsyncpa [#allocation6], 1 }
 0xdd0   :  { %3637 = vsyncpa [#allocation4], 1 }
 0xdd1   :  { %3638 = vsyncpa [#allocation10], 1 }

</bundles_post_ra>
